<compile_context>
chip_gen: v7x
topology: tpu7x:2x2x1
jax: 0.10.0
libtpu: 0.0.40
codegen_flags: <defaults>
</compile_context>

<pallas_src>
import functools

import jax
import jax.numpy as jnp
from jax.experimental import pallas as pl
from jax.experimental.pallas import tpu as pltpu


def _round_up(x, m):
    return ((x + m - 1) // m) * m


# -----------------------------------------------------------------------------
# Fused GRU kernel: one grid step = one chunk of Tc timesteps, all layers.
# -----------------------------------------------------------------------------
def _fused_gru_chunk_kernel(n_layers, Tc, Bp, Hp, vpu_input_proj, mxu_dtype,
                            unroll, *refs):
    """refs = x_ref, (w_ih, w_hh, b_gi, b_hn) * n_layers, out_ref, gi_ref, h_ref

    x_ref  : (Tc, Bp, Din)      time-major input chunk (layer 0), f32
    w_ih   : (Din_p, 3*Hp)      gate g occupies columns [g*Hp, g*Hp + H)
    w_hh   : (Hp, 3*Hp)
    b_gi   : (1, 3*Hp)          b_ih with b_hh folded in for r/z gates (f32)
    b_hn   : (1, Hp)            hidden-path bias of the n gate (f32)
    out_ref: (Tc, Bp, Hp)       chunk output block (reused as next layer input)
    gi_ref : (Tc, Bp, 3*Hp)     VMEM scratch: hoisted input projection
    h_ref  : (n_layers, Bp, Hp) VMEM scratch: hidden state carried across chunks
    """
    x_ref = refs[0]
    out_ref = refs[1 + 4 * n_layers]
    gi_ref = refs[2 + 4 * n_layers]
    h_ref = refs[3 + 4 * n_layers]

    @pl.when(pl.program_id(0) == 0)
    def _():
        h_ref[...] = jnp.zeros_like(h_ref)

    inp = x_ref[...]                                   # (Tc, Bp, d_in) f32

    for layer in range(n_layers):
        w_ih_ref = refs[1 + 4 * layer]
        w_hh_ref = refs[2 + 4 * layer]
        b_gi = refs[3 + 4 * layer][...]                # (1, 3*Hp) f32
        b_hn = refs[4 + 4 * layer][...]                # (1, Hp)   f32

        d_in = inp.shape[-1]
        inp2d = inp.reshape(Tc * Bp, d_in)

        # ---- input projection for the whole chunk (hoisted out of recurrence)
        if layer == 0 and vpu_input_proj:
            # d_in is tiny (< 128): instead of padding the input to a 128-lane
            # MXU tile, do d_in rank-1 updates on the VPU (same lane/sublane
            # broadcast pattern as softmax row ops).  All f32.
            gi_all = jnp.broadcast_to(b_gi, (Tc * Bp, 3 * Hp))
            for d in range(d_in):
                gi_all = gi_all + inp2d[:, d:d + 1] * w_ih_ref[d:d + 1, :]
        else:
            gi_all = jnp.dot(inp2d.astype(mxu_dtype), w_ih_ref[...],
                             preferred_element_type=jnp.float32) + b_gi
        gi_ref[...] = gi_all.reshape(Tc, Bp, 3 * Hp).astype(gi_ref.dtype)

        # Loop-invariant values hoisted out of the serial time loop.
        w_hh = w_hh_ref[...]                            # (Hp, 3*Hp) mxu_dtype
        b_hn_b = jnp.broadcast_to(b_hn, (Bp, Hp))       # n-gate hidden bias

        # ---- serial recurrence; h carried in vregs -------------------------
        def step(t, h, w_hh=w_hh, b_hn_b=b_hn_b):
            gi = gi_ref[t].astype(jnp.float32)          # (Bp, 3*Hp)
            gh = jnp.dot(h.astype(mxu_dtype), w_hh,
                         preferred_element_type=jnp.float32)
            r = jax.nn.sigmoid(gi[:, 0 * Hp:1 * Hp] + gh[:, 0 * Hp:1 * Hp])
            z = jax.nn.sigmoid(gi[:, 1 * Hp:2 * Hp] + gh[:, 1 * Hp:2 * Hp])
            n = jnp.tanh(gi[:, 2 * Hp:3 * Hp]
                         + r * (gh[:, 2 * Hp:3 * Hp] + b_hn_b))
            h_new = n + z * (h - n)                     # == (1-z)*n + z*h
            out_ref[t] = h_new
            return h_new

        h_last = jax.lax.fori_loop(0, Tc, step, h_ref[layer],
                                   unroll=min(unroll, Tc))
        h_ref[layer] = h_last

        # Next layer consumes this layer's (VMEM-resident) chunk output.
        inp = out_ref[...]


# -----------------------------------------------------------------------------
# Parameter preparation (pad / fold biases / transpose / pre-cast MXU operands).
# -----------------------------------------------------------------------------
def _pad_gate_matrix(w_t, rows, rows_p, H, Hp):
    """w_t: (rows, 3H) -> (rows_p, 3*Hp), gate g in columns [g*Hp, g*Hp+H)."""
    out = jnp.zeros((rows_p, 3 * Hp), jnp.float32)
    for g in range(3):
        out = out.at[:rows, g * Hp:g * Hp + H].set(w_t[:, g * H:(g + 1) * H])
    return out


def _prepare_kernel_params(raw_params, in_dim, d_in0, H, Hp, mxu_dtype,
                           vpu_input_proj):
    prepared = []
    for layer, (w_ih, w_hh, b_ih, b_hh) in enumerate(raw_params):
        din = in_dim if layer == 0 else H
        rows_p = d_in0 if layer == 0 else Hp

        w_ih_p = _pad_gate_matrix(w_ih.T.astype(jnp.float32), din, rows_p, H, Hp)
        w_hh_p = _pad_gate_matrix(w_hh.T.astype(jnp.float32), H, Hp, H, Hp)

        b_gi = jnp.zeros((1, 3 * Hp), jnp.float32)
        b_gi = b_gi.at[0, 0 * Hp:0 * Hp + H].set(b_ih[0:H] + b_hh[0:H])          # r
        b_gi = b_gi.at[0, 1 * Hp:1 * Hp + H].set(b_ih[H:2 * H] + b_hh[H:2 * H])  # z
        b_gi = b_gi.at[0, 2 * Hp:2 * Hp + H].set(b_ih[2 * H:3 * H])              # n (ih)
        b_hn = jnp.zeros((1, Hp), jnp.float32).at[0, :H].set(b_hh[2 * H:3 * H])  # n (hh)

        # Layer-0 w_ih stays f32 on the VPU input-projection path (never hits
        # the MXU); every MXU operand is pre-cast once here.
        w_ih_dtype = jnp.float32 if (layer == 0 and vpu_input_proj) else mxu_dtype
        prepared.append((w_ih_p.astype(w_ih_dtype),
                         w_hh_p.astype(mxu_dtype), b_gi, b_hn))
    return prepared


# -----------------------------------------------------------------------------
# Forward wrapper: x (B, T, in_dim) -> (B, T, hid_dim)   (batch_first output)
# -----------------------------------------------------------------------------
def gru_layer_forward(x_btd, raw_params, *, mxu_dtype=jnp.bfloat16,
                      chunk_t=64, recurrence_unroll=8):
    B, T, D = x_btd.shape
    H = raw_params[0][1].shape[1]            # w_hh: (3H, H)
    n_layers = len(raw_params)

    Bp = _round_up(B, 8)
    Hp = _round_up(H, 128)

    vpu_input_proj = D < 128                 # tiny in_dim -> VPU rank-1 path
    d_in0 = D if vpu_input_proj else _round_up(D, 128)

    Tc = min(chunk_t, T)
    Tp = _round_up(T, Tc)
    n_chunks = Tp // Tc

    exact_f32 = jnp.dtype(mxu_dtype) == jnp.dtype(jnp.float32)
    gi_dtype = jnp.float32 if exact_f32 else jnp.bfloat16

    kparams = _prepare_kernel_params(raw_params, D, d_in0, H, Hp, mxu_dtype,
                                     vpu_input_proj)

    # Time-major input, batch padded to 8 sublanes; time padded to the chunk
    # multiple (padded timesteps come after the real ones, so the causal
    # recurrence keeps real outputs exact; they are sliced off below).
    x_tbd = jnp.transpose(x_btd, (1, 0, 2)).astype(jnp.float32)
    x_p = jnp.zeros((Tp, Bp, d_in0), jnp.float32).at[:T, :B, :D].set(x_tbd)

    flat = [x_p]
    in_specs = [pl.BlockSpec((Tc, Bp, d_in0), lambda c: (c, 0, 0))]
    for (w_ih, w_hh, b_gi, b_hn) in kparams:
        flat.extend([w_ih, w_hh, b_gi, b_hn])
        in_specs.extend([
            pl.BlockSpec(w_ih.shape, lambda c: (0, 0)),   # resident across chunks
            pl.BlockSpec(w_hh.shape, lambda c: (0, 0)),
            pl.BlockSpec(b_gi.shape, lambda c: (0, 0)),
            pl.BlockSpec(b_hn.shape, lambda c: (0, 0)),
        ])

    # Explicit VMEM budget (double-buffered chunk blocks + resident weights +
    # scratch), clamped with headroom so it fits v5e's 16 MiB scoped default
    # and v7x's 64 MiB physical VMEM.
    buf_bytes = 2 * (Tc * Bp * d_in0 * 4 + Tc * Bp * Hp * 4)
    w_bytes = 2 * sum(int(a.size) * a.dtype.itemsize for p in kparams for a in p)
    scratch_bytes = (Tc * Bp * 3 * Hp * jnp.dtype(gi_dtype).itemsize
                     + n_layers * Bp * Hp * 4)
    vmem_limit = int(min(max(2 * (buf_bytes + w_bytes + scratch_bytes) + (2 << 20),
                             16 << 20), 40 << 20))

    kernel = functools.partial(_fused_gru_chunk_kernel, n_layers, Tc, Bp, Hp,
                               vpu_input_proj, mxu_dtype, recurrence_unroll)

    out_p = pl.pallas_call(
        kernel,
        grid=(n_chunks,),
        out_shape=jax.ShapeDtypeStruct((Tp, Bp, Hp), jnp.float32),
        in_specs=in_specs,
        out_specs=pl.BlockSpec((Tc, Bp, Hp), lambda c: (c, 0, 0)),
        scratch_shapes=[pltpu.VMEM((Tc, Bp, 3 * Hp), gi_dtype),
                        pltpu.VMEM((n_layers, Bp, Hp), jnp.float32)],
        compiler_params=pltpu.CompilerParams(
            dimension_semantics=("arbitrary",),        # h carries across chunks
            vmem_limit_bytes=vmem_limit),
    )(*flat)

    # Module contract is batch_first (B, T, H); keep the slice+transpose here.
    # (If the consumer can take time-major (T, B, H), return out_p[:T, :B, :H].)
    return jnp.transpose(out_p[:T, :B, :H], (1, 0, 2))


# -----------------------------------------------------------------------------
# PyTorch-style parameter init and pure-JAX reference for correctness.
# -----------------------------------------------------------------------------
def init_gru_params(key, in_dim, hid_dim, n_layers):
    """PyTorch layout: w_ih (3H, Din), w_hh (3H, H), b_ih (3H,), b_hh (3H,)."""
    bound = 1.0 / (hid_dim ** 0.5)
    params = []
    for layer in range(n_layers):
        d_in = in_dim if layer == 0 else hid_dim
        key, k1, k2, k3, k4 = jax.random.split(key, 5)
        w_ih = jax.random.uniform(k1, (3 * hid_dim, d_in), jnp.float32, -bound, bound)
        w_hh = jax.random.uniform(k2, (3 * hid_dim, hid_dim), jnp.float32, -bound, bound)
        b_ih = jax.random.uniform(k3, (3 * hid_dim,), jnp.float32, -bound, bound)
        b_hh = jax.random.uniform(k4, (3 * hid_dim,), jnp.float32, -bound, bound)
        params.append((w_ih, w_hh, b_ih, b_hh))
    return params


def gru_reference(x_btd, params):
    """Pure-JAX reference (lax.scan) matching torch.nn.GRU eval forward."""
    h_seq = jnp.transpose(x_btd, (1, 0, 2))            # (T, B, D)
    for (w_ih, w_hh, b_ih, b_hh) in params:
        H = w_hh.shape[1]

        def step(h, x_t, w_ih=w_ih, w_hh=w_hh, b_ih=b_ih, b_hh=b_hh, H=H):
            gi = x_t @ w_ih.T + b_ih
            gh = h @ w_hh.T + b_hh
            r = jax.nn.sigmoid(gi[:, :H] + gh[:, :H])
            z = jax.nn.sigmoid(gi[:, H:2 * H] + gh[:, H:2 * H])
            n = jnp.tanh(gi[:, 2 * H:] + r * gh[:, 2 * H:])
            h_new = (1.0 - z) * n + z * h
            return h_new, h_new

        h0 = jnp.zeros((h_seq.shape[1], H), jnp.float32)
        _, h_seq = jax.lax.scan(step, h0, h_seq)
    return jnp.transpose(h_seq, (1, 0, 2))              # (B, T, H)


if __name__ == "__main__":
    # Small shapes consistent with the module: batch=2, seq=8, in_dim=4,
    # hid_dim=32, n_layers=2 (inter-layer dropout is identity in eval mode).
    B, T, IN_DIM, HID_DIM, N_LAYERS = 2, 8, 4, 32, 2

    key = jax.random.PRNGKey(0)
    kx, kp = jax.random.split(key)
    x = jax.random.normal(kx, (B, T, IN_DIM), dtype=jnp.float32)
    params = init_gru_params(kp, IN_DIM, HID_DIM, N_LAYERS)

    ref = gru_reference(x, params)

    # (1) Exact-parity path: f32 MXU operands, small chunk (T=8, chunk=3 ->
    #     3 chunks incl. one padded timestep) so the cross-chunk hidden-state
    #     carry, pl.when init and time padding are all exercised.
    out_f32 = gru_layer_forward(x, params, mxu_dtype=jnp.float32, chunk_t=3)
    out_f32 = jax.block_until_ready(out_f32)
    assert out_f32.shape == (B, T, HID_DIM)
    assert jnp.allclose(out_f32, ref, atol=1e-4, rtol=1e-4), \
        float(jnp.max(jnp.abs(out_f32 - ref)))

    # (2) Fast path (default): bf16 MXU operands + bf16 GI scratch, one chunk.
    out_bf16 = gru_layer_forward(x, params)   # mxu_dtype=bf16, chunk_t=64
    out_bf16 = jax.block_until_ready(out_bf16)
    assert out_bf16.shape == (B, T, HID_DIM)
    assert jnp.allclose(out_bf16, ref, atol=3e-2, rtol=3e-2), \
        float(jnp.max(jnp.abs(out_bf16 - ref)))

    print("KERNEL_OK")
</pallas_src>

<mosaic_0001>
module attributes {stable_mosaic.version = 11 : i64} {
  func.func @_fused_gru_chunk_kernel(%arg0: i32, %arg1: memref<3x8x4xf32, #tpu.memory_space<vmem>>, %arg2: memref<4x384xf32, #tpu.memory_space<vmem>>, %arg3: memref<128x384xf32, #tpu.memory_space<vmem>>, %arg4: memref<1x384xf32, #tpu.memory_space<vmem>>, %arg5: memref<1x128xf32, #tpu.memory_space<vmem>>, %arg6: memref<128x384xf32, #tpu.memory_space<vmem>>, %arg7: memref<128x384xf32, #tpu.memory_space<vmem>>, %arg8: memref<1x384xf32, #tpu.memory_space<vmem>>, %arg9: memref<1x128xf32, #tpu.memory_space<vmem>>, %arg10: memref<3x8x128xf32, #tpu.memory_space<vmem>>, %arg11: memref<3x8x384xf32, #tpu.memory_space<vmem>>, %arg12: memref<2x8x128xf32, #tpu.memory_space<vmem>>) attributes {dimension_semantics = [#tpu.dimension_semantics<arbitrary>], iteration_bounds = array<i64: 3>, scalar_prefetch = 0 : i64, scratch_operands = 2 : i64, tpu.core_type = #tpu.core_type<tc>, window_params = [{transform_indices = @transform_0, window_bounds = array<i64: 3, 8, 4>}, {pipeline_mode = #tpu.pipeline_mode<synchronous>, transform_indices = @transform_1, window_bounds = array<i64: 4, 384>}, {pipeline_mode = #tpu.pipeline_mode<synchronous>, transform_indices = @transform_2, window_bounds = array<i64: 128, 384>}, {pipeline_mode = #tpu.pipeline_mode<synchronous>, transform_indices = @transform_3, window_bounds = array<i64: 1, 384>}, {pipeline_mode = #tpu.pipeline_mode<synchronous>, transform_indices = @transform_4, window_bounds = array<i64: 1, 128>}, {pipeline_mode = #tpu.pipeline_mode<synchronous>, transform_indices = @transform_5, window_bounds = array<i64: 128, 384>}, {pipeline_mode = #tpu.pipeline_mode<synchronous>, transform_indices = @transform_6, window_bounds = array<i64: 128, 384>}, {pipeline_mode = #tpu.pipeline_mode<synchronous>, transform_indices = @transform_7, window_bounds = array<i64: 1, 384>}, {pipeline_mode = #tpu.pipeline_mode<synchronous>, transform_indices = @transform_8, window_bounds = array<i64: 1, 128>}, {transform_indices = @transform_9, window_bounds = array<i64: 3, 8, 128>}]} {
    %c0_i32 = arith.constant 0 : i32
    %0 = arith.cmpi eq, %arg0, %c0_i32 : i32
    %1 = arith.extui %0 : i1 to i32
    %c0_i32_0 = arith.constant 0 : i32
    %2 = arith.cmpi ne, %1, %c0_i32_0 : i32
    scf.if %2 {
      %cst_90 = arith.constant 0.000000e+00 : f32
      %259 = vector.broadcast %cst_90 : f32 to vector<2x8x128xf32>
      %c0_91 = arith.constant 0 : index
      %c0_92 = arith.constant 0 : index
      %c0_93 = arith.constant 0 : index
      %260 = vector.load %arg12[%c0_91, %c0_92, %c0_93] : memref<2x8x128xf32, #tpu.memory_space<vmem>>, vector<2x8x128xf32>
      tpu.vector_store %arg12[%c0_91, %c0_92, %c0_93], %259 {strides = array<i32>} : memref<2x8x128xf32, #tpu.memory_space<vmem>>, vector<2x8x128xf32>,
    } else {
    }
    %c0 = arith.constant 0 : index
    %c0_1 = arith.constant 0 : index
    %c0_2 = arith.constant 0 : index
    %3 = vector.load %arg1[%c0, %c0_1, %c0_2] : memref<3x8x4xf32, #tpu.memory_space<vmem>>, vector<3x8x4xf32>
    %c0_3 = arith.constant 0 : index
    %c0_4 = arith.constant 0 : index
    %4 = vector.load %arg4[%c0_3, %c0_4] : memref<1x384xf32, #tpu.memory_space<vmem>>, vector<1x384xf32>
    %c0_5 = arith.constant 0 : index
    %c0_6 = arith.constant 0 : index
    %5 = vector.load %arg5[%c0_5, %c0_6] : memref<1x128xf32, #tpu.memory_space<vmem>>, vector<1x128xf32>
    %6 = vector.shape_cast %3 : vector<3x8x4xf32> to vector<24x4xf32>
    %7 = vector.shape_cast %4 : vector<1x384xf32> to vector<1x384xf32>
    %8 = vector.broadcast %7 : vector<1x384xf32> to vector<24x384xf32>
    %9 = vector.extract_strided_slice %6 {offsets = [0, 0], sizes = [24, 1], strides = [1, 1]} : vector<24x4xf32> to vector<24x1xf32>
    %c0_7 = arith.constant 0 : index
    %c0_8 = arith.constant 0 : index
    %10 = vector.load %arg2[%c0_7, %c0_8] : memref<4x384xf32, #tpu.memory_space<vmem>>, vector<1x384xf32>
    %11 = vector.broadcast %9 : vector<24x1xf32> to vector<24x384xf32>
    %12 = vector.broadcast %10 : vector<1x384xf32> to vector<24x384xf32>
    %13 = arith.mulf %11, %12 : vector<24x384xf32>
    %14 = arith.addf %8, %13 : vector<24x384xf32>
    %15 = vector.extract_strided_slice %6 {offsets = [0, 1], sizes = [24, 1], strides = [1, 1]} : vector<24x4xf32> to vector<24x1xf32>
    %c1 = arith.constant 1 : index
    %c0_9 = arith.constant 0 : index
    %16 = vector.load %arg2[%c1, %c0_9] : memref<4x384xf32, #tpu.memory_space<vmem>>, vector<1x384xf32>
    %17 = vector.broadcast %15 : vector<24x1xf32> to vector<24x384xf32>
    %18 = vector.broadcast %16 : vector<1x384xf32> to vector<24x384xf32>
    %19 = arith.mulf %17, %18 : vector<24x384xf32>
    %20 = arith.addf %14, %19 : vector<24x384xf32>
    %21 = vector.extract_strided_slice %6 {offsets = [0, 2], sizes = [24, 1], strides = [1, 1]} : vector<24x4xf32> to vector<24x1xf32>
    %c2 = arith.constant 2 : index
    %c0_10 = arith.constant 0 : index
    %22 = vector.load %arg2[%c2, %c0_10] : memref<4x384xf32, #tpu.memory_space<vmem>>, vector<1x384xf32>
    %23 = vector.broadcast %21 : vector<24x1xf32> to vector<24x384xf32>
    %24 = vector.broadcast %22 : vector<1x384xf32> to vector<24x384xf32>
    %25 = arith.mulf %23, %24 : vector<24x384xf32>
    %26 = arith.addf %20, %25 : vector<24x384xf32>
    %27 = vector.extract_strided_slice %6 {offsets = [0, 3], sizes = [24, 1], strides = [1, 1]} : vector<24x4xf32> to vector<24x1xf32>
    %c3 = arith.constant 3 : index
    %c0_11 = arith.constant 0 : index
    %28 = vector.load %arg2[%c3, %c0_11] : memref<4x384xf32, #tpu.memory_space<vmem>>, vector<1x384xf32>
    %29 = vector.broadcast %27 : vector<24x1xf32> to vector<24x384xf32>
    %30 = vector.broadcast %28 : vector<1x384xf32> to vector<24x384xf32>
    %31 = arith.mulf %29, %30 : vector<24x384xf32>
    %32 = arith.addf %26, %31 : vector<24x384xf32>
    %33 = vector.shape_cast %32 : vector<24x384xf32> to vector<3x8x384xf32>
    %c0_12 = arith.constant 0 : index
    %c0_13 = arith.constant 0 : index
    %c0_14 = arith.constant 0 : index
    %34 = vector.load %arg11[%c0_12, %c0_13, %c0_14] : memref<3x8x384xf32, #tpu.memory_space<vmem>>, vector<3x8x384xf32>
    tpu.vector_store %arg11[%c0_12, %c0_13, %c0_14], %33 {strides = array<i32>} : memref<3x8x384xf32, #tpu.memory_space<vmem>>, vector<3x8x384xf32>,
    %c0_15 = arith.constant 0 : index
    %c0_16 = arith.constant 0 : index
    %35 = vector.load %arg3[%c0_15, %c0_16] : memref<128x384xf32, #tpu.memory_space<vmem>>, vector<128x384xf32>
    %36 = vector.shape_cast %5 : vector<1x128xf32> to vector<1x128xf32>
    %37 = vector.broadcast %36 : vector<1x128xf32> to vector<8x128xf32>
    %c0_17 = arith.constant 0 : index
    %c0_18 = arith.constant 0 : index
    %c0_19 = arith.constant 0 : index
    %38 = vector.load %arg12[%c0_17, %c0_18, %c0_19] : memref<2x8x128xf32, #tpu.memory_space<vmem>>, vector<1x8x128xf32>
    %39 = vector.shape_cast %38 : vector<1x8x128xf32> to vector<8x128xf32>
    %c0_i32_20 = arith.constant 0 : i32
    %40 = arith.index_cast %c0_i32_20 : i32 to index
    %c0_21 = arith.constant 0 : index
    %c0_22 = arith.constant 0 : index
    %41 = vector.load %arg11[%40, %c0_21, %c0_22] : memref<3x8x384xf32, #tpu.memory_space<vmem>>, vector<1x8x384xf32>
    %42 = vector.shape_cast %41 : vector<1x8x384xf32> to vector<8x384xf32>
    %cst = arith.constant dense<0.000000e+00> : vector<8x384xf32>
    %43 = tpu.matmul %39, %35, %cst {dimension_numbers = #tpu.dot_dimension_numbers<[1], [0], [0], [1], [0, 0, 1, 1], [], []>} : vector<8x128xf32>, vector<128x384xf32>, vector<8x384xf32> -> vector<8x384xf32>
    %44 = vector.extract_strided_slice %42 {offsets = [0, 0], sizes = [8, 128], strides = [1, 1]} : vector<8x384xf32> to vector<8x128xf32>
    %45 = vector.extract_strided_slice %43 {offsets = [0, 0], sizes = [8, 128], strides = [1, 1]} : vector<8x384xf32> to vector<8x128xf32>
    %46 = arith.addf %44, %45 : vector<8x128xf32>
    %47 = arith.negf %46 : vector<8x128xf32>
    %48 = math.exp %47 : vector<8x128xf32>
    %cst_23 = arith.constant 1.000000e+00 : f32
    %49 = vector.broadcast %cst_23 : f32 to vector<8x128xf32>
    %50 = arith.addf %49, %48 : vector<8x128xf32>
    %51 = arith.divf %49, %50 : vector<8x128xf32>
    %52 = vector.extract_strided_slice %42 {offsets = [0, 128], sizes = [8, 128], strides = [1, 1]} : vector<8x384xf32> to vector<8x128xf32>
    %53 = vector.extract_strided_slice %43 {offsets = [0, 128], sizes = [8, 128], strides = [1, 1]} : vector<8x384xf32> to vector<8x128xf32>
    %54 = arith.addf %52, %53 : vector<8x128xf32>
    %55 = arith.negf %54 : vector<8x128xf32>
    %56 = math.exp %55 : vector<8x128xf32>
    %cst_24 = arith.constant 1.000000e+00 : f32
    %57 = vector.broadcast %cst_24 : f32 to vector<8x128xf32>
    %58 = arith.addf %57, %56 : vector<8x128xf32>
    %59 = arith.divf %57, %58 : vector<8x128xf32>
    %60 = vector.extract_strided_slice %42 {offsets = [0, 256], sizes = [8, 128], strides = [1, 1]} : vector<8x384xf32> to vector<8x128xf32>
    %61 = vector.extract_strided_slice %43 {offsets = [0, 256], sizes = [8, 128], strides = [1, 1]} : vector<8x384xf32> to vector<8x128xf32>
    %62 = arith.addf %61, %37 : vector<8x128xf32>
    %63 = arith.mulf %51, %62 : vector<8x128xf32>
    %64 = arith.addf %60, %63 : vector<8x128xf32>
    %65 = math.tanh %64 : vector<8x128xf32>
    %66 = arith.subf %39, %65 : vector<8x128xf32>
    %67 = arith.mulf %59, %66 : vector<8x128xf32>
    %68 = arith.addf %65, %67 : vector<8x128xf32>
    %69 = arith.index_cast %c0_i32_20 : i32 to index
    %c0_25 = arith.constant 0 : index
    %c0_26 = arith.constant 0 : index
    %70 = vector.load %arg10[%69, %c0_25, %c0_26] : memref<3x8x128xf32, #tpu.memory_space<vmem>>, vector<1x8x128xf32>
    %71 = vector.shape_cast %70 : vector<1x8x128xf32> to vector<8x128xf32>
    %72 = vector.shape_cast %68 : vector<8x128xf32> to vector<1x8x128xf32>
    tpu.vector_store %arg10[%69, %c0_25, %c0_26], %72 {strides = array<i32>} : memref<3x8x128xf32, #tpu.memory_space<vmem>>, vector<1x8x128xf32>,
    %c1_i32 = arith.constant 1 : i32
    %73 = arith.index_cast %c1_i32 : i32 to index
    %c0_27 = arith.constant 0 : index
    %c0_28 = arith.constant 0 : index
    %74 = vector.load %arg11[%73, %c0_27, %c0_28] : memref<3x8x384xf32, #tpu.memory_space<vmem>>, vector<1x8x384xf32>
    %75 = vector.shape_cast %74 : vector<1x8x384xf32> to vector<8x384xf32>
    %cst_29 = arith.constant dense<0.000000e+00> : vector<8x384xf32>
    %76 = tpu.matmul %68, %35, %cst_29 {dimension_numbers = #tpu.dot_dimension_numbers<[1], [0], [0], [1], [0, 0, 1, 1], [], []>} : vector<8x128xf32>, vector<128x384xf32>, vector<8x384xf32> -> vector<8x384xf32>
    %77 = vector.extract_strided_slice %75 {offsets = [0, 0], sizes = [8, 128], strides = [1, 1]} : vector<8x384xf32> to vector<8x128xf32>
    %78 = vector.extract_strided_slice %76 {offsets = [0, 0], sizes = [8, 128], strides = [1, 1]} : vector<8x384xf32> to vector<8x128xf32>
    %79 = arith.addf %77, %78 : vector<8x128xf32>
    %80 = arith.negf %79 : vector<8x128xf32>
    %81 = math.exp %80 : vector<8x128xf32>
    %cst_30 = arith.constant 1.000000e+00 : f32
    %82 = vector.broadcast %cst_30 : f32 to vector<8x128xf32>
    %83 = arith.addf %82, %81 : vector<8x128xf32>
    %84 = arith.divf %82, %83 : vector<8x128xf32>
    %85 = vector.extract_strided_slice %75 {offsets = [0, 128], sizes = [8, 128], strides = [1, 1]} : vector<8x384xf32> to vector<8x128xf32>
    %86 = vector.extract_strided_slice %76 {offsets = [0, 128], sizes = [8, 128], strides = [1, 1]} : vector<8x384xf32> to vector<8x128xf32>
    %87 = arith.addf %85, %86 : vector<8x128xf32>
    %88 = arith.negf %87 : vector<8x128xf32>
    %89 = math.exp %88 : vector<8x128xf32>
    %cst_31 = arith.constant 1.000000e+00 : f32
    %90 = vector.broadcast %cst_31 : f32 to vector<8x128xf32>
    %91 = arith.addf %90, %89 : vector<8x128xf32>
    %92 = arith.divf %90, %91 : vector<8x128xf32>
    %93 = vector.extract_strided_slice %75 {offsets = [0, 256], sizes = [8, 128], strides = [1, 1]} : vector<8x384xf32> to vector<8x128xf32>
    %94 = vector.extract_strided_slice %76 {offsets = [0, 256], sizes = [8, 128], strides = [1, 1]} : vector<8x384xf32> to vector<8x128xf32>
    %95 = arith.addf %94, %37 : vector<8x128xf32>
    %96 = arith.mulf %84, %95 : vector<8x128xf32>
    %97 = arith.addf %93, %96 : vector<8x128xf32>
    %98 = math.tanh %97 : vector<8x128xf32>
    %99 = arith.subf %68, %98 : vector<8x128xf32>
    %100 = arith.mulf %92, %99 : vector<8x128xf32>
    %101 = arith.addf %98, %100 : vector<8x128xf32>
    %102 = arith.index_cast %c1_i32 : i32 to index
    %c0_32 = arith.constant 0 : index
    %c0_33 = arith.constant 0 : index
    %103 = vector.load %arg10[%102, %c0_32, %c0_33] : memref<3x8x128xf32, #tpu.memory_space<vmem>>, vector<1x8x128xf32>
    %104 = vector.shape_cast %103 : vector<1x8x128xf32> to vector<8x128xf32>
    %105 = vector.shape_cast %101 : vector<8x128xf32> to vector<1x8x128xf32>
    tpu.vector_store %arg10[%102, %c0_32, %c0_33], %105 {strides = array<i32>} : memref<3x8x128xf32, #tpu.memory_space<vmem>>, vector<1x8x128xf32>,
    %c2_i32 = arith.constant 2 : i32
    %106 = arith.index_cast %c2_i32 : i32 to index
    %c0_34 = arith.constant 0 : index
    %c0_35 = arith.constant 0 : index
    %107 = vector.load %arg11[%106, %c0_34, %c0_35] : memref<3x8x384xf32, #tpu.memory_space<vmem>>, vector<1x8x384xf32>
    %108 = vector.shape_cast %107 : vector<1x8x384xf32> to vector<8x384xf32>
    %cst_36 = arith.constant dense<0.000000e+00> : vector<8x384xf32>
    %109 = tpu.matmul %101, %35, %cst_36 {dimension_numbers = #tpu.dot_dimension_numbers<[1], [0], [0], [1], [0, 0, 1, 1], [], []>} : vector<8x128xf32>, vector<128x384xf32>, vector<8x384xf32> -> vector<8x384xf32>
    %110 = vector.extract_strided_slice %108 {offsets = [0, 0], sizes = [8, 128], strides = [1, 1]} : vector<8x384xf32> to vector<8x128xf32>
    %111 = vector.extract_strided_slice %109 {offsets = [0, 0], sizes = [8, 128], strides = [1, 1]} : vector<8x384xf32> to vector<8x128xf32>
    %112 = arith.addf %110, %111 : vector<8x128xf32>
    %113 = arith.negf %112 : vector<8x128xf32>
    %114 = math.exp %113 : vector<8x128xf32>
    %cst_37 = arith.constant 1.000000e+00 : f32
    %115 = vector.broadcast %cst_37 : f32 to vector<8x128xf32>
    %116 = arith.addf %115, %114 : vector<8x128xf32>
    %117 = arith.divf %115, %116 : vector<8x128xf32>
    %118 = vector.extract_strided_slice %108 {offsets = [0, 128], sizes = [8, 128], strides = [1, 1]} : vector<8x384xf32> to vector<8x128xf32>
    %119 = vector.extract_strided_slice %109 {offsets = [0, 128], sizes = [8, 128], strides = [1, 1]} : vector<8x384xf32> to vector<8x128xf32>
    %120 = arith.addf %118, %119 : vector<8x128xf32>
    %121 = arith.negf %120 : vector<8x128xf32>
    %122 = math.exp %121 : vector<8x128xf32>
    %cst_38 = arith.constant 1.000000e+00 : f32
    %123 = vector.broadcast %cst_38 : f32 to vector<8x128xf32>
    %124 = arith.addf %123, %122 : vector<8x128xf32>
    %125 = arith.divf %123, %124 : vector<8x128xf32>
    %126 = vector.extract_strided_slice %108 {offsets = [0, 256], sizes = [8, 128], strides = [1, 1]} : vector<8x384xf32> to vector<8x128xf32>
    %127 = vector.extract_strided_slice %109 {offsets = [0, 256], sizes = [8, 128], strides = [1, 1]} : vector<8x384xf32> to vector<8x128xf32>
    %128 = arith.addf %127, %37 : vector<8x128xf32>
    %129 = arith.mulf %117, %128 : vector<8x128xf32>
    %130 = arith.addf %126, %129 : vector<8x128xf32>
    %131 = math.tanh %130 : vector<8x128xf32>
    %132 = arith.subf %101, %131 : vector<8x128xf32>
    %133 = arith.mulf %125, %132 : vector<8x128xf32>
    %134 = arith.addf %131, %133 : vector<8x128xf32>
    %135 = arith.index_cast %c2_i32 : i32 to index
    %c0_39 = arith.constant 0 : index
    %c0_40 = arith.constant 0 : index
    %136 = vector.load %arg10[%135, %c0_39, %c0_40] : memref<3x8x128xf32, #tpu.memory_space<vmem>>, vector<1x8x128xf32>
    %137 = vector.shape_cast %136 : vector<1x8x128xf32> to vector<8x128xf32>
    %138 = vector.shape_cast %134 : vector<8x128xf32> to vector<1x8x128xf32>
    tpu.vector_store %arg10[%135, %c0_39, %c0_40], %138 {strides = array<i32>} : memref<3x8x128xf32, #tpu.memory_space<vmem>>, vector<1x8x128xf32>,
    %c3_i32 = arith.constant 3 : i32
    %c0_41 = arith.constant 0 : index
    %c0_42 = arith.constant 0 : index
    %c0_43 = arith.constant 0 : index
    %139 = vector.load %arg12[%c0_41, %c0_42, %c0_43] : memref<2x8x128xf32, #tpu.memory_space<vmem>>, vector<1x8x128xf32>
    %140 = vector.shape_cast %139 : vector<1x8x128xf32> to vector<8x128xf32>
    %141 = vector.shape_cast %134 : vector<8x128xf32> to vector<1x8x128xf32>
    tpu.vector_store %arg12[%c0_41, %c0_42, %c0_43], %141 {strides = array<i32>} : memref<2x8x128xf32, #tpu.memory_space<vmem>>, vector<1x8x128xf32>,
    %c0_44 = arith.constant 0 : index
    %c0_45 = arith.constant 0 : index
    %c0_46 = arith.constant 0 : index
    %142 = vector.load %arg10[%c0_44, %c0_45, %c0_46] : memref<3x8x128xf32, #tpu.memory_space<vmem>>, vector<3x8x128xf32>
    %c0_47 = arith.constant 0 : index
    %c0_48 = arith.constant 0 : index
    %143 = vector.load %arg8[%c0_47, %c0_48] : memref<1x384xf32, #tpu.memory_space<vmem>>, vector<1x384xf32>
    %c0_49 = arith.constant 0 : index
    %c0_50 = arith.constant 0 : index
    %144 = vector.load %arg9[%c0_49, %c0_50] : memref<1x128xf32, #tpu.memory_space<vmem>>, vector<1x128xf32>
    %145 = vector.shape_cast %142 : vector<3x8x128xf32> to vector<24x128xf32>
    %c0_51 = arith.constant 0 : index
    %c0_52 = arith.constant 0 : index
    %146 = vector.load %arg6[%c0_51, %c0_52] : memref<128x384xf32, #tpu.memory_space<vmem>>, vector<128x384xf32>
    %cst_53 = arith.constant dense<0.000000e+00> : vector<24x384xf32>
    %147 = tpu.matmul %145, %146, %cst_53 {dimension_numbers = #tpu.dot_dimension_numbers<[1], [0], [0], [1], [0, 0, 1, 1], [], []>} : vector<24x128xf32>, vector<128x384xf32>, vector<24x384xf32> -> vector<24x384xf32>
    %148 = vector.broadcast %143 : vector<1x384xf32> to vector<24x384xf32>
    %149 = arith.addf %147, %148 : vector<24x384xf32>
    %150 = vector.shape_cast %149 : vector<24x384xf32> to vector<3x8x384xf32>
    %c0_54 = arith.constant 0 : index
    %c0_55 = arith.constant 0 : index
    %c0_56 = arith.constant 0 : index
    %151 = vector.load %arg11[%c0_54, %c0_55, %c0_56] : memref<3x8x384xf32, #tpu.memory_space<vmem>>, vector<3x8x384xf32>
    tpu.vector_store %arg11[%c0_54, %c0_55, %c0_56], %150 {strides = array<i32>} : memref<3x8x384xf32, #tpu.memory_space<vmem>>, vector<3x8x384xf32>,
    %c0_57 = arith.constant 0 : index
    %c0_58 = arith.constant 0 : index
    %152 = vector.load %arg7[%c0_57, %c0_58] : memref<128x384xf32, #tpu.memory_space<vmem>>, vector<128x384xf32>
    %153 = vector.shape_cast %144 : vector<1x128xf32> to vector<1x128xf32>
    %154 = vector.broadcast %153 : vector<1x128xf32> to vector<8x128xf32>
    %c1_59 = arith.constant 1 : index
    %c0_60 = arith.constant 0 : index
    %c0_61 = arith.constant 0 : index
    %155 = vector.load %arg12[%c1_59, %c0_60, %c0_61] : memref<2x8x128xf32, #tpu.memory_space<vmem>>, vector<1x8x128xf32>
    %156 = vector.shape_cast %155 : vector<1x8x128xf32> to vector<8x128xf32>
    %c0_i32_62 = arith.constant 0 : i32
    %157 = arith.index_cast %c0_i32_62 : i32 to index
    %c0_63 = arith.constant 0 : index
    %c0_64 = arith.constant 0 : index
    %158 = vector.load %arg11[%157, %c0_63, %c0_64] : memref<3x8x384xf32, #tpu.memory_space<vmem>>, vector<1x8x384xf32>
    %159 = vector.shape_cast %158 : vector<1x8x384xf32> to vector<8x384xf32>
    %cst_65 = arith.constant dense<0.000000e+00> : vector<8x384xf32>
    %160 = tpu.matmul %156, %152, %cst_65 {dimension_numbers = #tpu.dot_dimension_numbers<[1], [0], [0], [1], [0, 0, 1, 1], [], []>} : vector<8x128xf32>, vector<128x384xf32>, vector<8x384xf32> -> vector<8x384xf32>
    %161 = vector.extract_strided_slice %159 {offsets = [0, 0], sizes = [8, 128], strides = [1, 1]} : vector<8x384xf32> to vector<8x128xf32>
    %162 = vector.extract_strided_slice %160 {offsets = [0, 0], sizes = [8, 128], strides = [1, 1]} : vector<8x384xf32> to vector<8x128xf32>
    %163 = arith.addf %161, %162 : vector<8x128xf32>
    %164 = arith.negf %163 : vector<8x128xf32>
    %165 = math.exp %164 : vector<8x128xf32>
    %cst_66 = arith.constant 1.000000e+00 : f32
    %166 = vector.broadcast %cst_66 : f32 to vector<8x128xf32>
    %167 = arith.addf %166, %165 : vector<8x128xf32>
    %168 = arith.divf %166, %167 : vector<8x128xf32>
    %169 = vector.extract_strided_slice %159 {offsets = [0, 128], sizes = [8, 128], strides = [1, 1]} : vector<8x384xf32> to vector<8x128xf32>
    %170 = vector.extract_strided_slice %160 {offsets = [0, 128], sizes = [8, 128], strides = [1, 1]} : vector<8x384xf32> to vector<8x128xf32>
    %171 = arith.addf %169, %170 : vector<8x128xf32>
    %172 = arith.negf %171 : vector<8x128xf32>
    %173 = math.exp %172 : vector<8x128xf32>
    %cst_67 = arith.constant 1.000000e+00 : f32
    %174 = vector.broadcast %cst_67 : f32 to vector<8x128xf32>
    %175 = arith.addf %174, %173 : vector<8x128xf32>
    %176 = arith.divf %174, %175 : vector<8x128xf32>
    %177 = vector.extract_strided_slice %159 {offsets = [0, 256], sizes = [8, 128], strides = [1, 1]} : vector<8x384xf32> to vector<8x128xf32>
    %178 = vector.extract_strided_slice %160 {offsets = [0, 256], sizes = [8, 128], strides = [1, 1]} : vector<8x384xf32> to vector<8x128xf32>
    %179 = arith.addf %178, %154 : vector<8x128xf32>
    %180 = arith.mulf %168, %179 : vector<8x128xf32>
    %181 = arith.addf %177, %180 : vector<8x128xf32>
    %182 = math.tanh %181 : vector<8x128xf32>
    %183 = arith.subf %156, %182 : vector<8x128xf32>
    %184 = arith.mulf %176, %183 : vector<8x128xf32>
    %185 = arith.addf %182, %184 : vector<8x128xf32>
    %186 = arith.index_cast %c0_i32_62 : i32 to index
    %c0_68 = arith.constant 0 : index
    %c0_69 = arith.constant 0 : index
    %187 = vector.load %arg10[%186, %c0_68, %c0_69] : memref<3x8x128xf32, #tpu.memory_space<vmem>>, vector<1x8x128xf32>
    %188 = vector.shape_cast %187 : vector<1x8x128xf32> to vector<8x128xf32>
    %189 = vector.shape_cast %185 : vector<8x128xf32> to vector<1x8x128xf32>
    tpu.vector_store %arg10[%186, %c0_68, %c0_69], %189 {strides = array<i32>} : memref<3x8x128xf32, #tpu.memory_space<vmem>>, vector<1x8x128xf32>,
    %c1_i32_70 = arith.constant 1 : i32
    %190 = arith.index_cast %c1_i32_70 : i32 to index
    %c0_71 = arith.constant 0 : index
    %c0_72 = arith.constant 0 : index
    %191 = vector.load %arg11[%190, %c0_71, %c0_72] : memref<3x8x384xf32, #tpu.memory_space<vmem>>, vector<1x8x384xf32>
    %192 = vector.shape_cast %191 : vector<1x8x384xf32> to vector<8x384xf32>
    %cst_73 = arith.constant dense<0.000000e+00> : vector<8x384xf32>
    %193 = tpu.matmul %185, %152, %cst_73 {dimension_numbers = #tpu.dot_dimension_numbers<[1], [0], [0], [1], [0, 0, 1, 1], [], []>} : vector<8x128xf32>, vector<128x384xf32>, vector<8x384xf32> -> vector<8x384xf32>
    %194 = vector.extract_strided_slice %192 {offsets = [0, 0], sizes = [8, 128], strides = [1, 1]} : vector<8x384xf32> to vector<8x128xf32>
    %195 = vector.extract_strided_slice %193 {offsets = [0, 0], sizes = [8, 128], strides = [1, 1]} : vector<8x384xf32> to vector<8x128xf32>
    %196 = arith.addf %194, %195 : vector<8x128xf32>
    %197 = arith.negf %196 : vector<8x128xf32>
    %198 = math.exp %197 : vector<8x128xf32>
    %cst_74 = arith.constant 1.000000e+00 : f32
    %199 = vector.broadcast %cst_74 : f32 to vector<8x128xf32>
    %200 = arith.addf %199, %198 : vector<8x128xf32>
    %201 = arith.divf %199, %200 : vector<8x128xf32>
    %202 = vector.extract_strided_slice %192 {offsets = [0, 128], sizes = [8, 128], strides = [1, 1]} : vector<8x384xf32> to vector<8x128xf32>
    %203 = vector.extract_strided_slice %193 {offsets = [0, 128], sizes = [8, 128], strides = [1, 1]} : vector<8x384xf32> to vector<8x128xf32>
    %204 = arith.addf %202, %203 : vector<8x128xf32>
    %205 = arith.negf %204 : vector<8x128xf32>
    %206 = math.exp %205 : vector<8x128xf32>
    %cst_75 = arith.constant 1.000000e+00 : f32
    %207 = vector.broadcast %cst_75 : f32 to vector<8x128xf32>
    %208 = arith.addf %207, %206 : vector<8x128xf32>
    %209 = arith.divf %207, %208 : vector<8x128xf32>
    %210 = vector.extract_strided_slice %192 {offsets = [0, 256], sizes = [8, 128], strides = [1, 1]} : vector<8x384xf32> to vector<8x128xf32>
    %211 = vector.extract_strided_slice %193 {offsets = [0, 256], sizes = [8, 128], strides = [1, 1]} : vector<8x384xf32> to vector<8x128xf32>
    %212 = arith.addf %211, %154 : vector<8x128xf32>
    %213 = arith.mulf %201, %212 : vector<8x128xf32>
    %214 = arith.addf %210, %213 : vector<8x128xf32>
    %215 = math.tanh %214 : vector<8x128xf32>
    %216 = arith.subf %185, %215 : vector<8x128xf32>
    %217 = arith.mulf %209, %216 : vector<8x128xf32>
    %218 = arith.addf %215, %217 : vector<8x128xf32>
    %219 = arith.index_cast %c1_i32_70 : i32 to index
    %c0_76 = arith.constant 0 : index
    %c0_77 = arith.constant 0 : index
    %220 = vector.load %arg10[%219, %c0_76, %c0_77] : memref<3x8x128xf32, #tpu.memory_space<vmem>>, vector<1x8x128xf32>
    %221 = vector.shape_cast %220 : vector<1x8x128xf32> to vector<8x128xf32>
    %222 = vector.shape_cast %218 : vector<8x128xf32> to vector<1x8x128xf32>
    tpu.vector_store %arg10[%219, %c0_76, %c0_77], %222 {strides = array<i32>} : memref<3x8x128xf32, #tpu.memory_space<vmem>>, vector<1x8x128xf32>,
    %c2_i32_78 = arith.constant 2 : i32
    %223 = arith.index_cast %c2_i32_78 : i32 to index
    %c0_79 = arith.constant 0 : index
    %c0_80 = arith.constant 0 : index
    %224 = vector.load %arg11[%223, %c0_79, %c0_80] : memref<3x8x384xf32, #tpu.memory_space<vmem>>, vector<1x8x384xf32>
    %225 = vector.shape_cast %224 : vector<1x8x384xf32> to vector<8x384xf32>
    %cst_81 = arith.constant dense<0.000000e+00> : vector<8x384xf32>
    %226 = tpu.matmul %218, %152, %cst_81 {dimension_numbers = #tpu.dot_dimension_numbers<[1], [0], [0], [1], [0, 0, 1, 1], [], []>} : vector<8x128xf32>, vector<128x384xf32>, vector<8x384xf32> -> vector<8x384xf32>
    %227 = vector.extract_strided_slice %225 {offsets = [0, 0], sizes = [8, 128], strides = [1, 1]} : vector<8x384xf32> to vector<8x128xf32>
    %228 = vector.extract_strided_slice %226 {offsets = [0, 0], sizes = [8, 128], strides = [1, 1]} : vector<8x384xf32> to vector<8x128xf32>
    %229 = arith.addf %227, %228 : vector<8x128xf32>
    %230 = arith.negf %229 : vector<8x128xf32>
    %231 = math.exp %230 : vector<8x128xf32>
    %cst_82 = arith.constant 1.000000e+00 : f32
    %232 = vector.broadcast %cst_82 : f32 to vector<8x128xf32>
    %233 = arith.addf %232, %231 : vector<8x128xf32>
    %234 = arith.divf %232, %233 : vector<8x128xf32>
    %235 = vector.extract_strided_slice %225 {offsets = [0, 128], sizes = [8, 128], strides = [1, 1]} : vector<8x384xf32> to vector<8x128xf32>
    %236 = vector.extract_strided_slice %226 {offsets = [0, 128], sizes = [8, 128], strides = [1, 1]} : vector<8x384xf32> to vector<8x128xf32>
    %237 = arith.addf %235, %236 : vector<8x128xf32>
    %238 = arith.negf %237 : vector<8x128xf32>
    %239 = math.exp %238 : vector<8x128xf32>
    %cst_83 = arith.constant 1.000000e+00 : f32
    %240 = vector.broadcast %cst_83 : f32 to vector<8x128xf32>
    %241 = arith.addf %240, %239 : vector<8x128xf32>
    %242 = arith.divf %240, %241 : vector<8x128xf32>
    %243 = vector.extract_strided_slice %225 {offsets = [0, 256], sizes = [8, 128], strides = [1, 1]} : vector<8x384xf32> to vector<8x128xf32>
    %244 = vector.extract_strided_slice %226 {offsets = [0, 256], sizes = [8, 128], strides = [1, 1]} : vector<8x384xf32> to vector<8x128xf32>
    %245 = arith.addf %244, %154 : vector<8x128xf32>
    %246 = arith.mulf %234, %245 : vector<8x128xf32>
    %247 = arith.addf %243, %246 : vector<8x128xf32>
    %248 = math.tanh %247 : vector<8x128xf32>
    %249 = arith.subf %218, %248 : vector<8x128xf32>
    %250 = arith.mulf %242, %249 : vector<8x128xf32>
    %251 = arith.addf %248, %250 : vector<8x128xf32>
    %252 = arith.index_cast %c2_i32_78 : i32 to index
    %c0_84 = arith.constant 0 : index
    %c0_85 = arith.constant 0 : index
    %253 = vector.load %arg10[%252, %c0_84, %c0_85] : memref<3x8x128xf32, #tpu.memory_space<vmem>>, vector<1x8x128xf32>
    %254 = vector.shape_cast %253 : vector<1x8x128xf32> to vector<8x128xf32>
    %255 = vector.shape_cast %251 : vector<8x128xf32> to vector<1x8x128xf32>
    tpu.vector_store %arg10[%252, %c0_84, %c0_85], %255 {strides = array<i32>} : memref<3x8x128xf32, #tpu.memory_space<vmem>>, vector<1x8x128xf32>,
    %c3_i32_86 = arith.constant 3 : i32
    %c1_87 = arith.constant 1 : index
    %c0_88 = arith.constant 0 : index
    %c0_89 = arith.constant 0 : index
    %256 = vector.load %arg12[%c1_87, %c0_88, %c0_89] : memref<2x8x128xf32, #tpu.memory_space<vmem>>, vector<1x8x128xf32>
    %257 = vector.shape_cast %256 : vector<1x8x128xf32> to vector<8x128xf32>
    %258 = vector.shape_cast %251 : vector<8x128xf32> to vector<1x8x128xf32>
    tpu.vector_store %arg12[%c1_87, %c0_88, %c0_89], %258 {strides = array<i32>} : memref<2x8x128xf32, #tpu.memory_space<vmem>>, vector<1x8x128xf32>,
    return
  }
  func.func @transform_0(%arg0: i32) -> (i32, i32, i32) {
    %c0_i32 = arith.constant 0 : i32
    %c0_i32_0 = arith.constant 0 : i32
    %c0_i32_1 = arith.constant 0 : i32
    return %arg0, %c0_i32, %c0_i32_0 : i32, i32, i32
  }
  func.func @transform_1(%arg0: i32) -> (i32, i32) {
    %c0_i32 = arith.constant 0 : i32
    %c0_i32_0 = arith.constant 0 : i32
    %c0_i32_1 = arith.constant 0 : i32
    return %c0_i32, %c0_i32_0 : i32, i32
  }
  func.func @transform_2(%arg0: i32) -> (i32, i32) {
    %c0_i32 = arith.constant 0 : i32
    %c0_i32_0 = arith.constant 0 : i32
    %c0_i32_1 = arith.constant 0 : i32
    return %c0_i32, %c0_i32_0 : i32, i32
  }
  func.func @transform_3(%arg0: i32) -> (i32, i32) {
    %c0_i32 = arith.constant 0 : i32
    %c0_i32_0 = arith.constant 0 : i32
    %c0_i32_1 = arith.constant 0 : i32
    return %c0_i32, %c0_i32_0 : i32, i32
  }
  func.func @transform_4(%arg0: i32) -> (i32, i32) {
    %c0_i32 = arith.constant 0 : i32
    %c0_i32_0 = arith.constant 0 : i32
    %c0_i32_1 = arith.constant 0 : i32
    return %c0_i32, %c0_i32_0 : i32, i32
  }
  func.func @transform_5(%arg0: i32) -> (i32, i32) {
    %c0_i32 = arith.constant 0 : i32
    %c0_i32_0 = arith.constant 0 : i32
    %c0_i32_1 = arith.constant 0 : i32
    return %c0_i32, %c0_i32_0 : i32, i32
  }
  func.func @transform_6(%arg0: i32) -> (i32, i32) {
    %c0_i32 = arith.constant 0 : i32
    %c0_i32_0 = arith.constant 0 : i32
    %c0_i32_1 = arith.constant 0 : i32
    return %c0_i32, %c0_i32_0 : i32, i32
  }
  func.func @transform_7(%arg0: i32) -> (i32, i32) {
    %c0_i32 = arith.constant 0 : i32
    %c0_i32_0 = arith.constant 0 : i32
    %c0_i32_1 = arith.constant 0 : i32
    return %c0_i32, %c0_i32_0 : i32, i32
  }
  func.func @transform_8(%arg0: i32) -> (i32, i32) {
    %c0_i32 = arith.constant 0 : i32
    %c0_i32_0 = arith.constant 0 : i32
    %c0_i32_1 = arith.constant 0 : i32
    return %c0_i32, %c0_i32_0 : i32, i32
  }
  func.func @transform_9(%arg0: i32) -> (i32, i32, i32) {
    %c0_i32 = arith.constant 0 : i32
    %c0_i32_0 = arith.constant 0 : i32
    %c0_i32_1 = arith.constant 0 : i32
    return %arg0, %c0_i32, %c0_i32_0 : i32, i32, i32
  }
}

</mosaic_0001>

<bundles_post_ra>
// kernel: tpu_custom_call.1
= control target key start
LH: loop header
LB: loop body
LE: loop exit
PB: predicated region body
PF: predicated region fallthrough
CT: control target
= control target key end

     0   :  { %14 = vsyncpa [#allocation5], 0  ;;  %s4004_s0 = inlined_call_operand.vmem [shape: f32[9,8,4], index: 0, kind: input, shape index: {}]   ;;  %s4005_s1 = inlined_call_operand.vmem [shape: f32[4,384], index: 1, kind: input, shape index: {}]   ;;  %s4006_s2 = inlined_call_operand.hbm [shape: f32[128,384], index: 2, kind: input, shape index: {}]   ;;  %s4007_s3 = inlined_call_operand.vmem [shape: f32[1,384], index: 3, kind: input, shape index: {}]   ;;  %s4008_s4 = inlined_call_operand.vmem [shape: f32[1,128], index: 4, kind: input, shape index: {}]   ;;  %s4009_s5 = inlined_call_operand.hbm [shape: f32[128,384], index: 5, kind: input, shape index: {}]   ;;  %s4010_s6 = inlined_call_operand.hbm [shape: f32[128,384], index: 6, kind: input, shape index: {}]   ;;  %s4011_s7 = inlined_call_operand.vmem [shape: f32[1,384], index: 7, kind: input, shape index: {}]   ;;  %s4012_s8 = inlined_call_operand.vmem [shape: f32[1,128], index: 8, kind: input, shape index: {}]   ;;  %s4013_s9 = inlined_call_operand.hbm [shape: f32[9,8,128], index: 9, kind: output, shape index: {}]  }
   0x1   :  { %15 = vsyncpa [#allocation8], 0 }
   0x2   :  { %16 = vsyncpa [#allocation6], 0 }
   0x3   :  { %18 = vsyncpa [#allocation6 + $0x1], 0  ;;  %s3259_s30 = smov 0   ;;  %s3261_s10 = smov 0  }
   0x4   :  { %s3263_s11 = smov 0   ;;  %s3265_s12 = smov 0  }
   0x5 LB: > { %4030 = sst [smem:[#allocation14_spill]] %s3179_s30  ;;  %s3280_s13 = sadd.s32 4294967295, %s3191_s12   ;;  %s3191_s12 = sphi %s3265_s12, %s4056_s12   ;;  %s3187_s11 = sphi %s3263_s11, %s4058_s11   ;;  %s3183_s10 = sphi %s3261_s10, %s4060_s10   ;;  %s3179_s30 = sphi %s3259_s30, %s4059_s30  }
   0x6   : > { %4031 = sst [smem:[#allocation15_spill]] %s3187_s11  ;;  %s2069_s14 = sadd.s32 4294967294, %s3191_s12  }
   0x7   : > { %s3284_s15 = sadd.s32 1, %s3191_s12   ;;  %s225_s16 = sadd.s32 1, %s3187_s11 }
   0x8   : > { %4032 = sst [smem:[#allocation16_spill]] %s3284_s15  ;;  %s222_s17 = ssub.s32 %s3191_s12, %s3284_s15 }
   0x9   : > { %p235_p0 = scmp.ne.s32.totalorder %s3187_s11, %s3183_s10  ;;  %p223_p1 = scmp.eq.s32.totalorder %s222_s17, 0 }
   0xa   : > { %p236_p2 = scmp.eq.s32.totalorder %s3280_s13, 2  ;;  %p241_p3 = scmp.ne.s32.totalorder %s3183_s10, %s3179_s30 }
   0xb   : > { %p242_p4 = scmp.eq.s32.totalorder %s2069_s14, 2  ;;  %p2070_p7 = scmp.ge.s32.totalorder %s3191_s12, 1 }
   0xc   : > { %s3295_s18 = scalar_select %p223_p1, %s3187_s11, %s225_s16  }
   0xd   : > { %p3297_p5 = por %p236_p2, %p235_p0  ;;  %p3301_p6 = por %p242_p4, %p241_p3 }
   0xe   : > { %4033 = sst [smem:[#allocation17_spill]] %s3295_s18  ;;  %p249_p8 = scmp.lt.s32.totalorder %s3191_s12, 4 }
   0xf   : > { %s4034_s19 = scalar_select %p3297_p5, 1, 0 }
  0x10   : > { %s4035_s20 = scalar_select %p3301_p6, 1, 0 }
  0x11   : > { %p4014_p10 = scmp.eq.s32.totalorder %s3280_s13, 0  ;;  %p3309_p11 = pnand %p2070_p7, %p249_p8 }
  0x12   : > { %4036 = sst [smem:[#allocation18_spill]] %s4035_s20  ;;  %s3193_s22 = smov [#allocation7]  }
  0x13   : > { %s4037_s21 = scalar_select %p3309_p11, 1, 0 }
  0x14   : > { %p2897_p12 = pneg %p3309_p11  ;;  %s283_s23 = sshll.u32 %s3193_s22, 4  ;;  %s3315_s23 = int_to_ptr.vmem [resolvable:$true] %s283_s23 }
  0x15   : > { %s3194_s25 = smov [#allocation4]   ;;  %s3195_s27 = smov [#allocation9]  }
  0x16   : > { %p3319_p13 = pnand %p4014_p10, %p2897_p12  ;;  %s264_s26 = sshll.u32 %s3194_s25, 4  ;;  %s3323_s26 = int_to_ptr.vmem [resolvable:$true] %s264_s26 }
  0x17   : > { %s3325_s28 = sshll.u32 %s3195_s27, 4  ;;  %s3037_s16 = scalar_lea.hbm %s4009_s5, 6144  ;;  %s297_s28 = int_to_ptr.vmem [resolvable:$true] %s3325_s28 }
  0x18   : > { %p3038_p0 = scmp.ne.s32.totalorder %s4009_s5, %s3037_s16  ;;  %p3335_p1 = pneg %p3319_p13 }
  0x19   : > { %p3044_p4 = scmp.lt.u32.totalorder %s3037_s16, %s4009_s5 }
  0x1a   : > { %p3040_p2 = pnand %p3335_p1, %p3038_p0 }
  0x1c   : > { %p3041_p3 = pneg %p3040_p2 }
  0x1e   : > { %p3046_p7 = pnand %p3044_p4, %p3041_p3 }
  0x20   : > { %3049 = shalt.err (!%p3046_p7)
}
  0x21   : > { %s3050_s29 = scalar_lea.vmem %s3315_s23, 6144  ;;  %p3058_p10 = scmp.lt.s32.totalorder %s3315_s23, %s3315_s23 }
  0x22   : > { %p3051_p8 = scmp.ne.s32.totalorder %s3315_s23, %s3050_s29  ;;  %p3059_p6 = scmp.lt.s32.totalorder %s3050_s29, %s3050_s29 }
  0x24   : > { %p3053_p12 = pnand %p3051_p8, %p3335_p1  ;;  %p3060_p0 = por %p3059_p6, %p3058_p10 }
  0x26   : > { %p3054_p9 = pneg %p3053_p12 }
  0x28   : > { %p3061_p2 = pnand %p3060_p0, %p3054_p9 }
  0x2a   : > { %3064 = shalt.err (!%p3061_p2)
}
  0x2b   : > { %s3196_s14 = smov 384   ;;  %s3197_s16 = smov 24  }
  0x2c   : > { %2903 = dma.hbm_to_vmem [thread:$0]  (!%p3319_p13), %s4009_s5, 6144, %s3315_s23, [#allocation8], %s3196_s14, %s3196_s14, %s3197_s16  }
  0x2d   : > { %s3065_s29 = scalar_lea.hbm %s4006_s2, 6144 }
  0x2e   : > { %p3066_p6 = scmp.ne.s32.totalorder %s4006_s2, %s3065_s29  ;;  %p3072_p3 = scmp.lt.u32.totalorder %s3065_s29, %s4006_s2 }
  0x30   : > { %p3068_p9 = pnand %p3066_p6, %p3335_p1 }
  0x32   : > { %p3069_p10 = pneg %p3068_p9 }
  0x34   : > { %p3074_p4 = pnand %p3072_p3, %p3069_p10 }
  0x36   : > { %3077 = shalt.err (!%p3074_p4)
}
  0x37   : > { %s3078_s23 = scalar_lea.vmem %s3323_s26, 6144  ;;  %p3086_p0 = scmp.lt.s32.totalorder %s3323_s26, %s3323_s26 }
  0x38   : > { %p3079_p7 = scmp.ne.s32.totalorder %s3323_s26, %s3078_s23  ;;  %p3087_p2 = scmp.lt.s32.totalorder %s3078_s23, %s3078_s23 }
  0x3a   : > { %p3081_p8 = pnand %p3079_p7, %p3335_p1  ;;  %p3088_p6 = por %p3087_p2, %p3086_p0 }
  0x3c   : > { %p3082_p12 = pneg %p3081_p8 }
  0x3e   : > { %p3089_p9 = pnand %p3088_p6, %p3082_p12 }
  0x40   : > { %3092 = shalt.err (!%p3089_p9)
}
  0x41   : > { %2900 = dma.hbm_to_vmem [thread:$0]  (!%p3319_p13), %s4006_s2, 6144, %s3323_s26, [#allocation5], %s3196_s14, %s3196_s14, %s3197_s16  }
  0x42   : > { %s3093_s17 = scalar_lea.hbm %s4010_s6, 6144 }
  0x43   : > { %p3094_p10 = scmp.ne.s32.totalorder %s4010_s6, %s3093_s17  ;;  %p3100_p7 = scmp.lt.u32.totalorder %s3093_s17, %s4010_s6 }
  0x45   : > { %p3096_p3 = pnand %p3094_p10, %p3335_p1 }
  0x47   : > { %p3097_p4 = pneg %p3096_p3 }
  0x49   : > { %p3102_p8 = pnand %p3100_p7, %p3097_p4 }
  0x4b   : > { %3105 = shalt.err (!%p3102_p8)
}
  0x4c   : > { %s3106_s23 = scalar_lea.vmem %s297_s28, 6144  ;;  %p3114_p6 = scmp.lt.s32.totalorder %s297_s28, %s297_s28 }
  0x4d   : > { %p3107_p12 = scmp.ne.s32.totalorder %s297_s28, %s3106_s23  ;;  %p3115_p9 = scmp.lt.s32.totalorder %s3106_s23, %s3106_s23 }
  0x4f   : > { %p3109_p0 = pnand %p3107_p12, %p3335_p1  ;;  %p3116_p5 = por %p3115_p9, %p3114_p6 }
  0x51   : > { %p3110_p2 = pneg %p3109_p0 }
  0x53   : > { %p3117_p11 = pnand %p3116_p5, %p3110_p2 }
  0x55   : > { %3120 = shalt.err (!%p3117_p11)
}
  0x56   : > { %2906 = dma.hbm_to_vmem [thread:$0]  (!%p3319_p13), %s4010_s6, 6144, %s297_s28, [#allocation8], %s3196_s14, %s3196_s14, %s3197_s16  }
  0x57   : > { %p4040_p10 = scmp.ne.s32.totalorder %s4037_s21, 0 }
  0x59   : > { %327 = sbr.rel (%p4040_p10) target bundleno = 1732 (0x6c4), region = 56 }
  0x60   : > { %p4041_p1 = scmp.eq.s32.totalorder %s3280_s13, 0 }
  0x62   : > { %3166 = dma.done.wait (%p4041_p1), [#allocation5], 6144   ;;  %p4042_p3 = pmov %p4041_p1 }
  0x63   : > { %p4043_p5 = pmov %p4041_p1 }
  0x64   : > { %3168 = vsyncadd (%p4042_p3), [#allocation5], 4294961152 }
  0x65   : > { %3170 = dma.done.wait (%p4043_p5), [#allocation8], 12288   ;;  %p4044_p11 = pmov %p4041_p1 }
  0x66   : > { %s368_s18 = sand.u32 1, %s3183_s10   ;;  %s371_s24 = smul.u32 3, %s3280_s13 }
  0x67   : > { %3172 = vsyncadd (%p4044_p11), [#allocation8], 4294955008  ;;  %s2882_s21 = smul.u32 24, %s368_s18  ;;  %p4045_p4 = scmp.ne.s32.totalorder %s3280_s13, 0 }
  0x68   : > { %p372_p13 = scmp.lt.s32.totalorder %s371_s24, 8  ;;  %v3198_v0 = vmov (!%p4045_p4), 0.0  }
  0x69   : > { %s3426_s15 = scalar_lea.vmem [#allocation10], %s2882_s21  ;;  %381 = sbr.rel (%p4045_p4) target bundleno = 112 (0x70), region = 72  ;;  %382 = vst [vmem:[#allocation3] sm:$0xff] (!%p4045_p4), %v3198_v0  ;;  %383 = vst [vmem:[#allocation3 + $0x8] sm:$0xff] (!%p4045_p4), %v3198_v0 }
  0x6a   : > { %s4062_s24 = smov (!%p372_p13, %s371_s24), 8 }
  0x6b   : > { %s2079_s28 = sshll.u32 %s4062_s24, 3 }
  0x6c   : > { %s3424_s11 = scalar_lea.vmem %s4004_s0, %s2079_s28 }
  0x70 PF: > { %v609_v1 = vld [vmem:[#allocation4 + $0x8] sm:$0xff]  ;;  %v612_v2 = vld [vmem:[#allocation4 + $0x20] sm:$0xff]  ;;  %v611_v5 = vld [vmem:[#allocation4 + $0x18] sm:$0xff]  ;;  %v4027_v8 = vmov 0.0|0.0   ;;  %v4025_v9 = vmov 0.0   ;;  %vm3201_vm0 = vmmov 0  }
  0x71   : > { %v608_v3 = vld [vmem:[#allocation4] sm:$0xff]  ;;  %v3430_v4 = vpack.c.bf16 %v612_v2, %v609_v1  ;;  %v615_v6 = vld [vmem:[#allocation4 + $0x38] sm:$0xff]  ;;  %v618_v7 = vld [vmem:[#allocation4 + $0x50] sm:$0xff]  ;;  %2510 = vmatprep.subr.bf16.mxu1 %v4027_v8  ;;  %730 = vmatprep.mubr.f32.mxu0 %v4025_v9  ;;  %v3202_v15 = vmov 2   ;;  %v3203_v17 = vmov 0   ;;  %v4022_v63 = vmov 3  }
  0x72   : > { %v3434_v10 = vpack.c.bf16 %v611_v5, %v608_v3  ;;  %v3436_v11 = vpack.c.bf16 %v618_v7, %v615_v6  ;;  %v614_v12 = vld [vmem:[#allocation4 + $0x30] sm:$0xff]  ;;  %v617_v13 = vld [vmem:[#allocation4 + $0x48] sm:$0xff]  ;;  %2259 = vmatprep.mubr.msk.f32.mxu1 %vm3201_vm0, %v4025_v9  ;;  %2967 = vset.pattern.permute.xlu1 %v3202_v15  ;;  %v624_v16 = vld [vmem:[#allocation4 + $0x80] sm:$0xff]  ;;  %v4024_v0 = vmov 1   ;;  %s2105_s17 = smul.u32 384, %s3280_s13  ;;  %s1976_s22 = sshll.u32 %s3426_s15, 4  ;;  %s3958_s22 = int_to_ptr.vmem [resolvable:$true] %s1976_s22 }
  0x73   : > { %v621_v14 = vld [vmem:[#allocation4 + $0x68] sm:$0xff]  ;;  %2479 = vmatprep.subr.bf16.mxu0 %v3430_v4  ;;  %2965 = vset.pattern.permute.xlu0 %v3203_v17  ;;  %v3444_v18 = vpack.c.bf16 %v617_v13, %v614_v12  ;;  %v620_v20 = vld [vmem:[#allocation4 + $0x60] sm:$0xff]  ;;  %v623_v21 = vld [vmem:[#allocation4 + $0x78] sm:$0xff]  ;;  %s3963_s23 = scalar_lea.sflag [#allocation6], %s368_s18  ;;  %s3121_s13 = scalar_lea.vmem %s3958_s22, 384 }
  0x74   : > { %2481 = vmatpush1.bf16.msra.mxu0 %v3434_v10  ;;  %v3447_v19 = vpack.c.bf16 %v624_v16, %v621_v14  ;;  %v627_v22 = vld [vmem:[#allocation4 + $0x98] sm:$0xff]  ;;  %v630_v23 = vld [vmem:[#allocation4 + $0xb0] sm:$0xff]  ;;  %v3450_v24 = vpack.c.bf16 %v623_v21, %v620_v20  ;;  %v629_v27 = vld [vmem:[#allocation4 + $0xa8] sm:$0xff]  ;;  %s3956_s29 = scalar_lea.hbm %s4013_s9, %s2105_s17  ;;  %p3122_p7 = scmp.ne.s32.totalorder %s3958_s22, %s3121_s13 }
  0x75   : > { %2483 = vmatprep.subr.bf16.mxu0 %v3436_v11  ;;  %v626_v25 = vld [vmem:[#allocation4 + $0x90] sm:$0xff]  ;;  %v3453_v26 = vpack.c.bf16 %v630_v23, %v627_v22  ;;  %v613_v29 = vld [vmem:[#allocation4 + $0x28] sm:$0xff]  ;;  %v636_v31 = vld [vmem:[#allocation4 + $0xe0] sm:$0xff]  ;;  %p4052_p8 = scmp.ne.s32.totalorder %s4034_s19, 0  ;;  %s3206_s26 = smov [#allocation10]  }
  0x76   : > { %v610_v28 = vld [vmem:[#allocation4 + $0x10] sm:$0xff]  ;;  %v633_v30 = vld [vmem:[#allocation4 + $0xc8] sm:$0xff]  ;;  %v616_v33 = vld [vmem:[#allocation4 + $0x40] sm:$0xff]  ;;  %v3458_v35 = vpack.c.bf16 %v629_v27, %v626_v25  ;;  %s3125_s30 = sshll.u32 %s3206_s26, 4  ;;  %s3126_s30 = int_to_ptr.vmem [resolvable:$false] %s3125_s30 }
  0x77   : > { %v3455_v32 = vpack.c.bf16 %v613_v29, %v610_v28  ;;  %v619_v34 = vld [vmem:[#allocation4 + $0x58] sm:$0xff]  ;;  %v632_v36 = vld [vmem:[#allocation4 + $0xc0] sm:$0xff]  ;;  %v3464_v38 = vpack.c.bf16 %v636_v31, %v633_v30  ;;  %v622_v40 = vld [vmem:[#allocation4 + $0x70] sm:$0xff]  ;;  %p3123_p12 = pnand %p3122_p7, %p4052_p8  ;;  %s3127_s24 = scalar_lea.vmem %s3126_s30, 768 }
  0x78   : > { %2485 = vmatpush1.bf16.msra.mxu0 %v3444_v18  ;;  %v3461_v37 = vpack.c.bf16 %v619_v34, %v616_v33  ;;  %v635_v39 = vld [vmem:[#allocation4 + $0xd8] sm:$0xff]  ;;  %v625_v41 = vld [vmem:[#allocation4 + $0x88] sm:$0xff]  ;;  %v642_v43 = vld [vmem:[#allocation4 + $0x110] sm:$0xff]  ;;  %p3128_p2 = scmp.lt.s32.totalorder %s3958_s22, %s3126_s30  ;;  %p3129_p6 = scmp.lt.s32.totalorder %s3127_s24, %s3121_s13 }
  0x79   : > { %2487 = vmatprep.subr.bf16.mxu0 %v3447_v19  ;;  %2512 = vmatpush3.bf16.msra.mxu1 %v3455_v32  ;;  %v639_v42 = vld [vmem:[#allocation4 + $0xf8] sm:$0xff]  ;;  %v3468_v44 = vpack.c.bf16 %v635_v39, %v632_v36  ;;  %v638_v45 = vld [vmem:[#allocation4 + $0xf0] sm:$0xff]  ;;  %v3471_v46 = vpack.c.bf16 %v625_v41, %v622_v40  ;;  %v384_v47 = vld [vmem:[%s3424_s11] sm:$0xff]  ;;  %p3124_p0 = pneg %p3123_p12 }
  0x7a   : > { %2513 = vmatprep.subr.bf16.mxu1 %v4027_v8  ;;  %v3475_v48 = vpack.c.bf16 %v642_v43, %v639_v42  ;;  %v641_v49 = vld [vmem:[#allocation4 + $0x108] sm:$0xff]  ;;  %v628_v50 = vld [vmem:[#allocation4 + $0xa0] sm:$0xff]  ;;  %v631_v51 = vld [vmem:[#allocation4 + $0xb8] sm:$0xff]  ;;  %506 = vperm.xlu1 %2967, %v384_v47   ;;  %p3130_p9 = por %p3129_p6, %p3128_p2 }
  0x7b   : > { %v645_v52 = vld [vmem:[#allocation4 + $0x128] sm:$0xff]  ;;  %v648_v53 = vld [vmem:[#allocation4 + $0x140] sm:$0xff]  ;;  %408 = vperm.xlu0 %2965, %v384_v47   ;;  %v3479_v54 = vpack.c.bf16 %v641_v49, %v638_v45  ;;  %v3482_v56 = vpack.c.bf16 %v631_v51, %v628_v50  ;;  %v647_v58 = vld [vmem:[#allocation4 + $0x138] sm:$0xff] }
  0x7c   : > { %2489 = vmatpush1.bf16.msra.mxu0 %v3450_v24  ;;  %v644_v55 = vld [vmem:[#allocation4 + $0x120] sm:$0xff]  ;;  %v3485_v57 = vpack.c.bf16 %v648_v53, %v645_v52  ;;  %v634_v59 = vld [vmem:[#allocation4 + $0xd0] sm:$0xff]  ;;  %v637_v60 = vld [vmem:[#allocation4 + $0xe8] sm:$0xff]  ;;  %p3131_p10 = pnand %p3130_p9, %p3124_p0 }
  0x7d   : > { %2491 = vmatprep.subr.bf16.mxu0 %v3453_v26  ;;  %2515 = vmatpush3.bf16.msra.mxu1 %v3461_v37  ;;  %v651_v61 = vld [vmem:[#allocation4 + $0x158] sm:$0xff]  ;;  %v654_v62 = vld [vmem:[#allocation4 + $0x170] sm:$0xff]  ;;  %v3491_v1 = vpack.c.bf16 %v647_v58, %v644_v55  ;;  %v3494_v3 = vpack.c.bf16 %v637_v60, %v634_v59  ;;  %v653_v6 = vld [vmem:[#allocation4 + $0x168] sm:$0xff] }
  0x7e   : > { %2516 = vmatprep.subr.bf16.mxu1 %v4027_v8  ;;  %2968 = vset.pattern.permute.xlu1 %v4022_v63  ;;  %v650_v2 = vld [vmem:[#allocation4 + $0x150] sm:$0xff]  ;;  %v3497_v5 = vpack.c.bf16 %v654_v62, %v651_v61  ;;  %v640_v7 = vld [vmem:[#allocation4 + $0x100] sm:$0xff]  ;;  %v643_v12 = vld [vmem:[#allocation4 + $0x118] sm:$0xff] }
  0x7f   : > { %2966 = vset.pattern.permute.xlu0 %v4024_v0  ;;  %554 = vperm.xlu1 %2968, %v384_v47   ;;  %v385_v13 = vld [vmem:[%s3424_s11 + $0x8] sm:$0xff]  ;;  %v3503_v14 = vpack.c.bf16 %v653_v6, %v650_v2  ;;  %v3506_v16 = vpack.c.bf16 %v643_v12, %v640_v7  ;;  %v649_v21 = vld [vmem:[#allocation4 + $0x148] sm:$0xff]  ;;  %v652_v25 = vld [vmem:[#allocation4 + $0x160] sm:$0xff] }
  0x80   : > { %2493 = vmatpush1.bf16.msra.mxu0 %v3458_v35  ;;  %458 = vperm.xlu0 %2966, %v384_v47   ;;  %v646_v20 = vld [vmem:[#allocation4 + $0x130] sm:$0xff]  ;;  %v655_v27 = vld [vmem:[#allocation4 + $0x178] sm:$0xff] }
  0x81   : > { %2495 = vmatprep.subr.bf16.mxu0 %v3464_v38  ;;  %2518 = vmatpush3.bf16.msra.mxu1 %v3471_v46  ;;  %v3512_v22 = vld [vmem:[#allocation3] sm:$0xff]  ;;  %v3515_v23 = vpack.c.bf16 %v649_v21, %v646_v20  ;;  %v3522_v28 = vpack.c.bf16 %v655_v27, %v652_v25 }
  0x82   : > { %2519 = vmatprep.subr.bf16.mxu1 %v4027_v8  ;;  %v405_v30 = vld [vmem:[%s4005_s1] ss:$4 sm:$0x7]  ;;  %v2081_v34 = vld [vmem:[%s4005_s1 + $0x1] ss:$4 sm:$0x7] }
  0x83   : > { %2969 = vset.pattern.permute.xlu1 %v3203_v17  ;;  %v2082_v42 = vld [vmem:[%s4005_s1 + $0x2] ss:$4 sm:$0x7]  ;;  %v2083_v50 = vld [vmem:[%s4005_s1 + $0x3] ss:$4 sm:$0x7] }
  0x84   : > { %2497 = vmatpush1.bf16.msra.mxu0 %v3468_v44  ;;  %462 = vperm.xlu0 %2966, %v385_v13  }
  0x85   : > { %2499 = vmatprep.subr.bf16.mxu0 %v3475_v48  ;;  %2521 = vmatpush3.bf16.msra.mxu1 %v3482_v56 }
  0x86   : > { %2522 = vmatprep.subr.bf16.mxu1 %v4027_v8  ;;  %413 = vperm.xlu1 %2969, %v385_v13  }
  0x88   : > { %2501 = vmatpush1.bf16.msra.mxu0 %v3479_v54  ;;  %2971 = vset.pattern.permute.xlu0 %v4022_v63 }
  0x89   : > { %2503 = vmatprep.subr.bf16.mxu0 %v3485_v57  ;;  %2524 = vmatpush3.bf16.msra.mxu1 %v3494_v3 }
  0x8a   : > { %2525 = vmatprep.subr.bf16.mxu1 %v4027_v8  ;;  %558 = vperm.xlu0 %2971, %v385_v13  }
  0x8b   : > { %2970 = vset.pattern.permute.xlu1 %v3202_v15 }
  0x8c   : > { %2505 = vmatpush1.bf16.msra.mxu0 %v3491_v1  ;;  %510 = vperm.xlu1 %2970, %v385_v13  }
  0x8d   : > { %2507 = vmatprep.subr.bf16.mxu0 %v3497_v5  ;;  %2527 = vmatpush3.bf16.msra.mxu1 %v3506_v16 }
  0x8e   : > { %2528 = vmatprep.subr.bf16.mxu1 %v4027_v8  ;;  %2974 = vset.pattern.permute.xlu0 %v3202_v15  ;;  %v390_v15 = vlaneseq }
  0x90   : > { %2509 = vmatpush1.bf16.msra.mxu0 %v3503_v14  ;;  %2972 = vset.pattern.permute.xlu1 %v3203_v17  ;;  %v391_v17 = vshrl.u32 %v390_v15, 7 }
  0x91   : > { %2535 = vmatprep.subr.bf16.mxu0 %v3430_v4  ;;  %2530 = vmatpush3.bf16.msra.mxu1 %v3515_v23 }
  0x92   : > { %2531 = vmatprep.subr.bf16.mxu1 %v4027_v8  ;;  %v3565_v29 = vsub.s32 0, %v391_v17  ;;  %v3579_v36 = vsub.s32 1, %v391_v17 }
  0x93   : > { %731 = vmatmul.mubr.f32.vlgmr.msra.gmra.mrb[0].mxu0 %v3512_v22 }
  0x94   : > { %2537 = vmatpush1.bf16.msra.mxu0 %v3434_v10  ;;  %897 = vmatprep.mubr.f32.mxu0 %v4025_v9  ;;  %v3571_v33 = vrot.slane %v405_v30, %v3565_v29  ;;  %4046 = vst [vmem:[#allocation19_spill] sm:$0xff] %v3579_v36  ;;  %v3586_v41 = vrot.slane %v2081_v34, %v3565_v29 }
  0x95   : > { %2539 = vmatprep.subr.bf16.mxu0 %v3436_v11  ;;  %2533 = vmatpush3.bf16.msra.mxu1 %v3522_v28  ;;  %v3592_v45 = vrot.slane %v2082_v42, %v3565_v29  ;;  %v3595_v47 = vrot.slane %v405_v30, %v3579_v36  ;;  %v3606_v55 = vrot.slane %v2083_v50, %v3565_v29 }
  0x96   : > { %2566 = vmatprep.subr.bf16.mxu1 %v4027_v8  ;;  %v3611_v60 = vrot.slane %v2081_v34, %v3579_v36  ;;  %v3614_v62 = vrot.slane %v2082_v42, %v3579_v36  ;;  %v3621_v21 = vrot.slane %v2083_v50, %v3579_v36 }
  0x98   : > { %2541 = vmatpush1.bf16.msra.mxu0 %v3444_v18  ;;  %2260 = vmatmul.mubr.f32.vlgmr.msra.gmra.mrb[0].mxu1 %v3512_v22 }
  0x99   : > { %2543 = vmatprep.subr.bf16.mxu0 %v3447_v19  ;;  %2568 = vmatpush3.bf16.msra.mxu1 %v3455_v32 }
  0x9a   : > { %2569 = vmatprep.subr.bf16.mxu1 %v4027_v8  ;;  %2294 = vmatprep.mubr.msk.f32.mxu1 %vm3201_vm0, %v4025_v9 }
  0x9c   : > { %2545 = vmatpush1.bf16.msra.mxu0 %v3450_v24 }
  0x9d   : > { %2547 = vmatprep.subr.bf16.mxu0 %v3453_v26  ;;  %2571 = vmatpush3.bf16.msra.mxu1 %v3461_v37 }
  0x9e   : > { %2572 = vmatprep.subr.bf16.mxu1 %v4027_v8 }
  0xa0   : > { %2549 = vmatpush1.bf16.msra.mxu0 %v3458_v35 }
  0xa1   : > { %2551 = vmatprep.subr.bf16.mxu0 %v3464_v38  ;;  %2574 = vmatpush3.bf16.msra.mxu1 %v3471_v46 }
  0xa2   : > { %2575 = vmatprep.subr.bf16.mxu1 %v4027_v8 }
  0xa4   : > { %2553 = vmatpush1.bf16.msra.mxu0 %v3468_v44 }
  0xa5   : > { %2555 = vmatprep.subr.bf16.mxu0 %v3475_v48  ;;  %2577 = vmatpush3.bf16.msra.mxu1 %v3482_v56 }
  0xa6   : > { %2578 = vmatprep.subr.bf16.mxu1 %v4027_v8 }
  0xa8   : > { %2557 = vmatpush1.bf16.msra.mxu0 %v3479_v54 }
  0xa9   : > { %2559 = vmatprep.subr.bf16.mxu0 %v3485_v57  ;;  %2580 = vmatpush3.bf16.msra.mxu1 %v3494_v3 }
  0xaa   : > { %2581 = vmatprep.subr.bf16.mxu1 %v4027_v8 }
  0xac   : > { %2561 = vmatpush1.bf16.msra.mxu0 %v3491_v1 }
  0xad   : > { %2563 = vmatprep.subr.bf16.mxu0 %v3497_v5  ;;  %2583 = vmatpush3.bf16.msra.mxu1 %v3506_v16 }
  0xae   : > { %2584 = vmatprep.subr.bf16.mxu1 %v4027_v8 }
  0xb0   : > { %2565 = vmatpush1.bf16.msra.mxu0 %v3503_v14 }
  0xb1   : > { %2591 = vmatprep.subr.bf16.mxu0 %v3430_v4  ;;  %2586 = vmatpush3.bf16.msra.mxu1 %v3515_v23  ;;  %v387_v4 = vld [vmem:[%s4007_s3] sm:$0x7] }
  0xb2   : > { %2587 = vmatprep.subr.bf16.mxu1 %v4027_v8  ;;  %v3582_v39 = vrot.slane %v387_v4, %v3565_v29  ;;  %v3603_v53 = vrot.slane %v387_v4, %v3579_v36 }
  0xb5   : > { %2589 = vmatpush3.bf16.msra.mxu1 %v3522_v28 }
  0xb6   : > { %2622 = vmatprep.subr.bf16.mxu1 %v4027_v8 }
  0xf9   : > { %v507_v52 = vpop.permute.xlu1 %506 }
  0xfa   : > { %v409_v31 = vpop.permute.xlu0 %408  ;;  %v533_v58 = vmul.f32 %v3592_v45, %v507_v52  ;;  %v534_v20 = vmul.f32 %v3614_v62, %v507_v52 }
  0xfb   : > { %v437_v40 = vmul.f32 %v3571_v33, %v409_v31  ;;  %v438_v59 = vmul.f32 %v3595_v47, %v409_v31 }
  0xfd   : > { %v446_v49 = vadd.f32 %v437_v40, %v3582_v39  ;;  %v447_v6 = vadd.f32 %v438_v59, %v3603_v53  ;;  %v3624_v59 = vsub.s32 2, %v391_v17 }
  0xfe   : > { %v555_v2 = vpop.permute.xlu1 %554 }
  0xff   : > { %v459_v43 = vpop.permute.xlu0 %458  ;;  %v581_v7 = vmul.f32 %v3606_v55, %v555_v2 }
 0x100   : > { %v485_v51 = vmul.f32 %v3586_v41, %v459_v43  ;;  %v486_v12 = vmul.f32 %v3611_v60, %v459_v43 }
 0x102   : > { %v494_v61 = vadd.f32 %v485_v51, %v446_v49  ;;  %v495_v25 = vadd.f32 %v486_v12, %v447_v6  ;;  %v582_v51 = vmul.f32 %v3621_v21, %v555_v2  ;;  %v3630_v6 = vrot.slane %v387_v4, %v3624_v59 }
 0x103   : > { %v3634_v12 = vrot.slane %v2081_v34, %v3624_v59  ;;  %v3643_v4 = vrot.slane %v2083_v50, %v3624_v59  ;;  %v3648_v34 = vld [vmem:[%s4008_s4] ss:$0 sm:$0xff] }
 0x104   : > { %v542_v13 = vadd.f32 %v533_v58, %v494_v61  ;;  %v543_v0 = vadd.f32 %v534_v20, %v495_v25  ;;  %v3627_v58 = vrot.slane %v405_v30, %v3624_v59 }
 0x105   : > { %v487_v30 = vmul.f32 %v3634_v12, %v459_v43 }
 0x106   : > { %v590_v27 = vadd.f32 %v581_v7, %v542_v13  ;;  %v591_v9 = vadd.f32 %v582_v51, %v543_v0  ;;  %v439_v7 = vmul.f32 %v3627_v58, %v409_v31 }
 0x108   : > { %v448_v0 = vadd.f32 %v439_v7, %v3630_v6 }
 0x10a   : > { %v496_v31 = vadd.f32 %v487_v30, %v448_v0 }
 0x166   : > { %v732_v15 = vpop.f32.mrb[0].mxu0 }
 0x167   : > { %v807_v40 = vadd.f32 %v732_v15, %v590_v27  ;;  %v734_v49 = vpop.f32.mrb[1].mxu0 }
 0x168   : > { %v814_v61 = vadd.f32 %v734_v49, %v591_v9 }
 0x169   : > { %v2085_v63 = vmul.f32 -1.442695, %v807_v40 }
 0x16a   : > { %v2086_v13 = vmul.f32 -1.442695, %v814_v61 }
 0x16b   : > { %2977 = vpow2.f32 %v2085_v63  ;;  %v803_v8 = vpop.f32.mrb[0].mxu1  ;;  %v3637_v63 = vrot.slane %v2082_v42, %v3624_v59 }
 0x16c   : > { %v2261_v36 = vpop.f32.mrb[1].mxu1  ;;  %2979 = vpow2.f32 %v2086_v13  ;;  %v821_v25 = vadd.f32 %v3648_v34, %v803_v8  ;;  %v4047_v8 = vmov 0.0|0.0  }
 0x16d   : > { %v535_v9 = vmul.f32 %v3637_v63, %v507_v52  ;;  %v583_v36 = vmul.f32 %v3643_v4, %v555_v2  ;;  %v4048_v2 = vmov 0.0  }
 0x16f   : > { %v544_v42 = vadd.f32 %v535_v9, %v496_v31 }
 0x171   : > { %v592_v15 = vadd.f32 %v583_v36, %v544_v42 }
 0x175   : > { %v2978_v20 = vpop.eup %2977 }
 0x176   : > { %v811_v17 = vadd.f32 1.0, %v2978_v20  ;;  %v2980_v27 = vpop.eup %2979 }
 0x177   : > { %v818_v49 = vadd.f32 1.0, %v2980_v27 }
 0x178   : > { %2981 = vrcp.f32 %v811_v17 }
 0x182   : > { %v2982_v43 = vpop.eup %2981 }
 0x183   : > { %v822_v40 = vmul.f32 %v2982_v43, %v821_v25 }
 0x185   : > { %v823_v52 = vadd.f32 %v822_v40, %v592_v15 }
 0x187   : > { %2983 = vtanh.f32 %v823_v52 }
 0x188   : > { %2985 = vrcp.f32 %v818_v49 }
 0x191   : > { %v2984_v50 = vpop.eup %2983 }
 0x192   : > { %v825_v51 = vsub.f32 %v3512_v22, %v2984_v50  ;;  %v2986_v61 = vpop.eup %2985 }
 0x194   : > { %v826_v7 = vmul.f32 %v2986_v61, %v825_v51 }
 0x196   : > { %v3653_v13 = vadd.f32 %v2984_v50, %v826_v7 }
 0x198   : > { %898 = vmatmul.mubr.f32.vlgmr.msra.gmra.mrb[2].mxu0 %v3653_v13  ;;  %2295 = vmatmul.mubr.f32.vlgmr.msra.gmra.mrb[2].mxu1 %v3653_v13 }
 0x199   : > { %2593 = vmatpush1.bf16.msra.mxu0 %v3434_v10  ;;  %2624 = vmatpush3.bf16.msra.mxu1 %v3455_v32  ;;  %v1172_v10 = vld [vmem:[#allocation7 + $0x8] sm:$0xff]  ;;  %v414_v32 = vpop.permute.xlu1 %413 }
 0x19a   : > { %2595 = vmatprep.subr.bf16.mxu0 %v3436_v11  ;;  %2625 = vmatprep.subr.bf16.mxu1 %v4047_v8  ;;  %v1175_v11 = vld [vmem:[#allocation7 + $0x20] sm:$0xff]  ;;  %v442_v27 = vmul.f32 %v3627_v58, %v414_v32 }
 0x19b   : > { %1065 = vmatprep.mubr.f32.mxu0 %v4048_v2  ;;  %2329 = vmatprep.mubr.msk.f32.mxu1 %vm3201_vm0, %v4048_v2 }
 0x19c   : > { %v451_v49 = vadd.f32 %v442_v27, %v3630_v6  ;;  %v1188_v27 = vld [vmem:[#allocation7 + $0x88] sm:$0xff] }
 0x19d   : > { %2597 = vmatpush1.bf16.msra.mxu0 %v3444_v18  ;;  %2627 = vmatpush3.bf16.msra.mxu1 %v3461_v37  ;;  %v2646_v18 = vpack.c.bf16 %v1175_v11, %v1172_v10  ;;  %v463_v37 = vpop.permute.xlu0 %462 }
 0x19e   : > { %2599 = vmatprep.subr.bf16.mxu0 %v3447_v19  ;;  %2628 = vmatprep.subr.bf16.mxu1 %v4047_v8  ;;  %v386_v19 = vld [vmem:[%s3424_s11 + $0x10] sm:$0xff]  ;;  %v490_v52 = vmul.f32 %v3634_v12, %v463_v37 }
 0x19f   : > { %418 = vperm.xlu1 %2972, %v386_v19   ;;  %514 = vperm.xlu0 %2974, %v386_v19  }
 0x1a0   : > { %v499_v50 = vadd.f32 %v490_v52, %v451_v49  ;;  %v1189_v52 = vld [vmem:[#allocation7 + $0x90] sm:$0xff] }
 0x1a1   : > { %2601 = vmatpush1.bf16.msra.mxu0 %v3450_v24  ;;  %2630 = vmatpush3.bf16.msra.mxu1 %v3471_v46  ;;  %v4049_v24 = vmov 1   ;;  %v511_v46 = vpop.permute.xlu1 %510 }
 0x1a2   : > { %2603 = vmatprep.subr.bf16.mxu0 %v3453_v26  ;;  %2631 = vmatprep.subr.bf16.mxu1 %v4047_v8  ;;  %v4050_v26 = vmov 3   ;;  %v537_v22 = vmul.f32 %v3614_v62, %v511_v46  ;;  %v538_v51 = vmul.f32 %v3637_v63, %v511_v46 }
 0x1a3   : > { %2973 = vset.pattern.permute.xlu1 %v4049_v24  ;;  %2976 = vset.pattern.permute.xlu0 %v4050_v26 }
 0x1a4   : > { %466 = vperm.xlu1 %2973, %v386_v19   ;;  %v547_v61 = vadd.f32 %v538_v51, %v499_v50  ;;  %v1192_v51 = vld [vmem:[#allocation7 + $0xa8] sm:$0xff] }
 0x1a5   : > { %2605 = vmatpush1.bf16.msra.mxu0 %v3458_v35  ;;  %2633 = vmatpush3.bf16.msra.mxu1 %v3482_v56  ;;  %v440_v35 = vmul.f32 %v3571_v33, %v414_v32  ;;  %v536_v56 = vmul.f32 %v3592_v45, %v511_v46  ;;  %v1176_v46 = vld [vmem:[#allocation7 + $0x28] sm:$0xff] }
 0x1a6   : > { %2607 = vmatprep.subr.bf16.mxu0 %v3464_v38  ;;  %2634 = vmatprep.subr.bf16.mxu1 %v4047_v8 }
 0x1a7   : > { %v449_v38 = vadd.f32 %v440_v35, %v3582_v39 }
 0x1a8   : > { %2975 = vset.pattern.permute.xlu1 %v4050_v26 }
 0x1a9   : > { %2609 = vmatpush1.bf16.msra.mxu0 %v3468_v44  ;;  %2636 = vmatpush3.bf16.msra.mxu1 %v3494_v3  ;;  %v488_v44 = vmul.f32 %v3586_v41, %v463_v37  ;;  %v489_v3 = vmul.f32 %v3611_v60, %v463_v37  ;;  %v1171_v37 = vld [vmem:[#allocation7] sm:$0xff] }
 0x1aa   : > { %2611 = vmatprep.subr.bf16.mxu0 %v3475_v48  ;;  %2637 = vmatprep.subr.bf16.mxu1 %v4047_v8  ;;  %v441_v48 = vmul.f32 %v3595_v47, %v414_v32 }
 0x1ab   : > { %562 = vperm.xlu1 %2975, %v386_v19  }
 0x1ad   : > { %2613 = vmatpush1.bf16.msra.mxu0 %v3479_v54  ;;  %2639 = vmatpush3.bf16.msra.mxu1 %v3506_v16  ;;  %v497_v54 = vadd.f32 %v488_v44, %v449_v38  ;;  %v1174_v44 = vld [vmem:[#allocation7 + $0x18] sm:$0xff] }
 0x1ae   : > { %2615 = vmatprep.subr.bf16.mxu0 %v3485_v57  ;;  %2640 = vmatprep.subr.bf16.mxu1 %v4047_v8  ;;  %v559_v57 = vpop.permute.xlu0 %558 }
 0x1af   : > { %v585_v9 = vmul.f32 %v3621_v21, %v559_v57  ;;  %v586_v7 = vmul.f32 %v3643_v4, %v559_v57 }
 0x1b1   : > { %2617 = vmatpush1.bf16.msra.mxu0 %v3491_v1  ;;  %2642 = vmatpush3.bf16.msra.mxu1 %v3515_v23  ;;  %v450_v1 = vadd.f32 %v441_v48, %v3603_v53  ;;  %v595_v19 = vadd.f32 %v586_v7, %v547_v61  ;;  %v1173_v48 = vld [vmem:[#allocation7 + $0x10] sm:$0xff]  ;;  %v1191_v61 = vld [vmem:[#allocation7 + $0xa0] sm:$0xff]  ;;  %v1194_v7 = vld [vmem:[#allocation7 + $0xb8] sm:$0xff] }
 0x1b2   : > { %2619 = vmatprep.subr.bf16.mxu0 %v3497_v5  ;;  %2643 = vmatprep.subr.bf16.mxu1 %v4047_v8  ;;  %v584_v5 = vmul.f32 %v3606_v55, %v559_v57  ;;  %v1181_v57 = vld [vmem:[#allocation7 + $0x50] sm:$0xff] }
 0x1b3   : > { %v498_v16 = vadd.f32 %v489_v3, %v450_v1  ;;  %v2648_v3 = vpack.c.bf16 %v1174_v44, %v1171_v37  ;;  %v1200_v37 = vld [vmem:[#allocation7 + $0xe8] sm:$0xff]  ;;  %v1205_v44 = vld [vmem:[#allocation7 + $0x110] sm:$0xff] }
 0x1b5   : > { %2621 = vmatpush1.bf16.msra.mxu0 %v3503_v14  ;;  %2645 = vmatpush3.bf16.msra.mxu1 %v3522_v28  ;;  %v545_v14 = vadd.f32 %v536_v56, %v497_v54  ;;  %v546_v36 = vadd.f32 %v537_v22, %v498_v16  ;;  %v1178_v56 = vld [vmem:[#allocation7 + $0x38] sm:$0xff] }
 0x1b6   : > { %2678 = vmatprep.subr.bf16.mxu1 %v4047_v8  ;;  %2647 = vmatprep.subr.bf16.mxu0 %v2646_v18  ;;  %v2650_v22 = vpack.c.bf16 %v1181_v57, %v1178_v56  ;;  %v1204_v57 = vld [vmem:[#allocation7 + $0x108] sm:$0xff] }
 0x1b7   : > { %v593_v23 = vadd.f32 %v584_v5, %v545_v14  ;;  %v594_v42 = vadd.f32 %v585_v9, %v546_v36  ;;  %v2679_v5 = vpack.c.bf16 %v1176_v46, %v1173_v48  ;;  %v1177_v14 = vld [vmem:[#allocation7 + $0x30] sm:$0xff] }
 0x26b   : > { %v899_v28 = vpop.f32.mrb[2].mxu0  ;;  %v970_v20 = vpop.f32.mrb[2].mxu1 }
 0x26c   : > { %v974_v17 = vadd.f32 %v899_v28, %v593_v23  ;;  %v901_v0 = vpop.f32.mrb[3].mxu0  ;;  %v2296_v30 = vpop.f32.mrb[3].mxu1  ;;  %v988_v11 = vadd.f32 %v3648_v34, %v970_v20  ;;  %v1180_v23 = vld [vmem:[#allocation7 + $0x48] sm:$0xff]  ;;  %v1179_v28 = vld [vmem:[#allocation7 + $0x40] sm:$0xff]  ;;  %v1182_v20 = vld [vmem:[#allocation7 + $0x58] sm:$0xff] }
 0x26d   : > { %v981_v25 = vadd.f32 %v901_v0, %v594_v42  ;;  %v1187_v0 = vld [vmem:[#allocation7 + $0x80] sm:$0xff]  ;;  %v2652_v30 = vpack.c.bf16 %v1180_v23, %v1177_v14  ;;  %v2682_v9 = vpack.c.bf16 %v1182_v20, %v1179_v28  ;;  %v1186_v42 = vld [vmem:[#allocation7 + $0x78] sm:$0xff] }
 0x26e   : > { %v2087_v31 = vmul.f32 -1.442695, %v974_v17  ;;  %v1184_v17 = vld [vmem:[#allocation7 + $0x68] sm:$0xff]  ;;  %v1211_v14 = vld [vmem:[#allocation7 + $0x140] sm:$0xff] }
 0x26f   : > { %v2088_v43 = vmul.f32 -1.442695, %v981_v25  ;;  %v2654_v36 = vpack.c.bf16 %v1187_v0, %v1184_v17  ;;  %v1185_v25 = vld [vmem:[#allocation7 + $0x70] sm:$0xff]  ;;  %v1207_v28 = vld [vmem:[#allocation7 + $0x120] sm:$0xff]  ;;  %v1210_v17 = vld [vmem:[#allocation7 + $0x138] sm:$0xff] }
 0x270   : > { %2987 = vpow2.f32 %v2087_v31  ;;  %v1183_v31 = vld [vmem:[#allocation7 + $0x60] sm:$0xff]  ;;  %v2685_v49 = vpack.c.bf16 %v1188_v27, %v1185_v25  ;;  %v1209_v0 = vld [vmem:[#allocation7 + $0x130] sm:$0xff] }
 0x271   : > { %2989 = vpow2.f32 %v2088_v43  ;;  %v1190_v43 = vld [vmem:[#allocation7 + $0x98] sm:$0xff]  ;;  %v1213_v25 = vld [vmem:[#allocation7 + $0x150] sm:$0xff] }
 0x27a   : > { %v2988_v15 = vpop.eup %2987 }
 0x27b   : > { %v978_v40 = vadd.f32 1.0, %v2988_v15  ;;  %v2990_v10 = vpop.eup %2989  ;;  %v1193_v15 = vld [vmem:[#allocation7 + $0xb0] sm:$0xff] }
 0x27c   : > { %v985_v32 = vadd.f32 1.0, %v2990_v10  ;;  %v2658_v50 = vpack.c.bf16 %v1193_v15, %v1190_v43  ;;  %v1196_v10 = vld [vmem:[#allocation7 + $0xc8] sm:$0xff]  ;;  %v1215_v15 = vld [vmem:[#allocation7 + $0x160] sm:$0xff] }
 0x27d   : > { %2991 = vrcp.f32 %v978_v40  ;;  %v2656_v40 = vpack.c.bf16 %v1186_v42, %v1183_v31  ;;  %v1217_v31 = vld [vmem:[#allocation7 + $0x170] sm:$0xff]  ;;  %v1216_v43 = vld [vmem:[#allocation7 + $0x168] sm:$0xff] }
 0x287   : > { %v2992_v18 = vpop.eup %2991 }
 0x288   : > { %v989_v24 = vmul.f32 %v2992_v18, %v988_v11  ;;  %v1199_v11 = vld [vmem:[#allocation7 + $0xe0] sm:$0xff]  ;;  %v2660_v18 = vpack.c.bf16 %v1192_v51, %v1189_v52 }
 0x289   : > { %v1411_v51 = vld [vmem:[#allocation9 + $0x20] sm:$0xff] }
 0x28a   : > { %v990_v26 = vadd.f32 %v989_v24, %v595_v19  ;;  %v2688_v19 = vpack.c.bf16 %v1194_v7, %v1191_v61  ;;  %v1195_v24 = vld [vmem:[#allocation7 + $0xc0] sm:$0xff] }
 0x28b   : > { %v1407_v7 = vld [vmem:[#allocation9] sm:$0xff] }
 0x28c   : > { %2993 = vtanh.f32 %v990_v26  ;;  %v2662_v26 = vpack.c.bf16 %v1199_v11, %v1196_v10  ;;  %v1414_v11 = vld [vmem:[#allocation9 + $0x38] sm:$0xff] }
 0x28d   : > { %2995 = vrcp.f32 %v985_v32  ;;  %v1198_v32 = vld [vmem:[#allocation7 + $0xd8] sm:$0xff] }
 0x28e   : > { %v2664_v48 = vpack.c.bf16 %v1198_v32, %v1195_v24  ;;  %v1413_v24 = vld [vmem:[#allocation9 + $0x30] sm:$0xff] }
 0x296   : > { %v2994_v35 = vpop.eup %2993 }
 0x297   : > { %v992_v38 = vsub.f32 %v3653_v13, %v2994_v35  ;;  %v2996_v54 = vpop.eup %2995 }
 0x299   : > { %v993_v1 = vmul.f32 %v2996_v54, %v992_v38  ;;  %v1202_v38 = vld [vmem:[#allocation7 + $0xf8] sm:$0xff]  ;;  %v1201_v54 = vld [vmem:[#allocation7 + $0xf0] sm:$0xff] }
 0x29a   : > { %v2666_v56 = vpack.c.bf16 %v1205_v44, %v1202_v38  ;;  %v1419_v44 = vld [vmem:[#allocation9 + $0x60] sm:$0xff] }
 0x29b   : > { %v3712_v16 = vadd.f32 %v2994_v35, %v993_v1  ;;  %v1197_v35 = vld [vmem:[#allocation7 + $0xd0] sm:$0xff]  ;;  %v1203_v1 = vld [vmem:[#allocation7 + $0x100] sm:$0xff] }
 0x29c   : > { %v2691_v46 = vpack.c.bf16 %v1200_v37, %v1197_v35  ;;  %v1420_v35 = vld [vmem:[#allocation9 + $0x68] sm:$0xff]  ;;  %v1423_v37 = vld [vmem:[#allocation9 + $0x80] sm:$0xff] }
 0x29d   : > { %1066 = vmatmul.mubr.f32.vlgmr.msra.gmra.mrb[4].mxu0 %v3712_v16  ;;  %2330 = vmatmul.mubr.f32.vlgmr.msra.gmra.mrb[4].mxu1 %v3712_v16  ;;  %v3749_v38 = vpack.c.bf16 %v1423_v37, %v1420_v35  ;;  %v1415_v35 = vld [vmem:[#allocation9 + $0x40] sm:$0xff]  ;;  %v1418_v37 = vld [vmem:[#allocation9 + $0x58] sm:$0xff] }
 0x29e   : > { %2649 = vmatpush1.bf16.msra.mxu0 %v2648_v3  ;;  %2680 = vmatpush3.bf16.msra.mxu1 %v2679_v5  ;;  %v1206_v3 = vld [vmem:[#allocation7 + $0x118] sm:$0xff]  ;;  %v1208_v5 = vld [vmem:[#allocation7 + $0x128] sm:$0xff] }
 0x29f   : > { %2651 = vmatprep.subr.bf16.mxu0 %v2650_v22  ;;  %2681 = vmatprep.subr.bf16.mxu1 %v4047_v8  ;;  %v2668_v22 = vpack.c.bf16 %v1204_v57, %v1201_v54  ;;  %v2694_v23 = vpack.c.bf16 %v1206_v3, %v1203_v1  ;;  %v2670_v20 = vpack.c.bf16 %v1211_v14, %v1208_v5  ;;  %v1426_v54 = vld [vmem:[#allocation9 + $0x98] sm:$0xff]  ;;  %v1425_v1 = vld [vmem:[#allocation9 + $0x90] sm:$0xff]  ;;  %v1428_v3 = vld [vmem:[#allocation9 + $0xa8] sm:$0xff] }
 0x2a0   : > { %1299 = vmatprep.mubr.f32.mxu0 %v4048_v2  ;;  %2364 = vmatprep.mubr.msk.f32.mxu1 %vm3201_vm0, %v4048_v2  ;;  %v3757_v5 = vpack.c.bf16 %v1428_v3, %v1425_v1  ;;  %v1432_v14 = vld [vmem:[#allocation9 + $0xc8] sm:$0xff]  ;;  %v1430_v3 = vld [vmem:[#allocation9 + $0xb8] sm:$0xff] }
 0x2a2   : > { %2653 = vmatpush1.bf16.msra.mxu0 %v2652_v30  ;;  %2683 = vmatpush3.bf16.msra.mxu1 %v2682_v9  ;;  %v1212_v30 = vld [vmem:[#allocation7 + $0x148] sm:$0xff]  ;;  %v1214_v9 = vld [vmem:[#allocation7 + $0x158] sm:$0xff] }
 0x2a3   : > { %2655 = vmatprep.subr.bf16.mxu0 %v2654_v36  ;;  %2684 = vmatprep.subr.bf16.mxu1 %v4047_v8  ;;  %v2672_v36 = vpack.c.bf16 %v1210_v17, %v1207_v28  ;;  %v2697_v42 = vpack.c.bf16 %v1212_v30, %v1209_v0  ;;  %v2674_v27 = vpack.c.bf16 %v1217_v31, %v1214_v9  ;;  %v1431_v28 = vld [vmem:[#allocation9 + $0xc0] sm:$0xff]  ;;  %v1438_v0 = vld [vmem:[#allocation9 + $0xf8] sm:$0xff]  ;;  %v1441_v30 = vld [vmem:[#allocation9 + $0x110] sm:$0xff] }
 0x2a4   : > { %v3767_v9 = vpack.c.bf16 %v1441_v30, %v1438_v0  ;;  %v1437_v31 = vld [vmem:[#allocation9 + $0xf0] sm:$0xff]  ;;  %v1439_v0 = vld [vmem:[#allocation9 + $0x100] sm:$0xff]  ;;  %v1442_v30 = vld [vmem:[#allocation9 + $0x118] sm:$0xff] }
 0x2a6   : > { %2657 = vmatpush1.bf16.msra.mxu0 %v2656_v40  ;;  %2686 = vmatpush3.bf16.msra.mxu1 %v2685_v49  ;;  %v1218_v40 = vld [vmem:[#allocation7 + $0x178] sm:$0xff]  ;;  %v2676_v49 = vpack.c.bf16 %v1216_v43, %v1213_v25  ;;  %v1444_v25 = vld [vmem:[#allocation9 + $0x128] sm:$0xff] }
 0x2a7   : > { %2659 = vmatprep.subr.bf16.mxu0 %v2658_v50  ;;  %2687 = vmatprep.subr.bf16.mxu1 %v4047_v8  ;;  %v2700_v52 = vpack.c.bf16 %v1218_v40, %v1215_v15  ;;  %v1408_v50 = vld [vmem:[#allocation9 + $0x8] sm:$0xff]  ;;  %v1443_v15 = vld [vmem:[#allocation9 + $0x120] sm:$0xff]  ;;  %v1446_v40 = vld [vmem:[#allocation9 + $0x138] sm:$0xff] }
 0x2a8   : > { %v3737_v61 = vpack.c.bf16 %v1411_v51, %v1408_v50  ;;  %v1412_v50 = vld [vmem:[#allocation9 + $0x28] sm:$0xff] }
 0x2aa   : > { %2661 = vmatpush1.bf16.msra.mxu0 %v2660_v18  ;;  %2689 = vmatpush3.bf16.msra.mxu1 %v2688_v19  ;;  %v1417_v18 = vld [vmem:[#allocation9 + $0x50] sm:$0xff] }
 0x2ab   : > { %2663 = vmatprep.subr.bf16.mxu0 %v2662_v26  ;;  %2690 = vmatprep.subr.bf16.mxu1 %v4047_v8  ;;  %v3743_v19 = vpack.c.bf16 %v1417_v18, %v1414_v11  ;;  %v1416_v26 = vld [vmem:[#allocation9 + $0x48] sm:$0xff]  ;;  %v1449_v18 = vld [vmem:[#allocation9 + $0x150] sm:$0xff] }
 0x2ac   : > { %v3745_v32 = vpack.c.bf16 %v1416_v26, %v1413_v24  ;;  %v1452_v24 = vld [vmem:[#allocation9 + $0x168] sm:$0xff] }
 0x2ad   : > { %v3784_v26 = vpack.c.bf16 %v1452_v24, %v1449_v18 }
 0x2ae   : > { %2665 = vmatpush1.bf16.msra.mxu0 %v2664_v48  ;;  %2692 = vmatpush3.bf16.msra.mxu1 %v2691_v46  ;;  %v1422_v48 = vld [vmem:[#allocation9 + $0x78] sm:$0xff] }
 0x2af   : > { %2667 = vmatprep.subr.bf16.mxu0 %v2666_v56  ;;  %2693 = vmatprep.subr.bf16.mxu1 %v4047_v8  ;;  %v3751_v46 = vpack.c.bf16 %v1422_v48, %v1419_v44  ;;  %v1429_v56 = vld [vmem:[#allocation9 + $0xb0] sm:$0xff]  ;;  %v3788_v44 = vpack.c.bf16 %v1418_v37, %v1415_v35  ;;  %v515_v35 = vpop.permute.xlu0 %514 }
 0x2b0   : > { %v3755_v57 = vpack.c.bf16 %v1429_v56, %v1426_v54  ;;  %v1421_v48 = vld [vmem:[#allocation9 + $0x70] sm:$0xff]  ;;  %v1424_v54 = vld [vmem:[#allocation9 + $0x88] sm:$0xff]  ;;  %v1427_v56 = vld [vmem:[#allocation9 + $0xa0] sm:$0xff] }
 0x2b1   : > { %v3794_v1 = vpack.c.bf16 %v1424_v54, %v1421_v48  ;;  %v539_v54 = vmul.f32 %v3592_v45, %v515_v35 }
 0x2b2   : > { %2669 = vmatpush1.bf16.msra.mxu0 %v2668_v22  ;;  %2695 = vmatpush3.bf16.msra.mxu1 %v2694_v23  ;;  %v1435_v22 = vld [vmem:[#allocation9 + $0xe0] sm:$0xff] }
 0x2b3   : > { %2671 = vmatprep.subr.bf16.mxu0 %v2670_v20  ;;  %2696 = vmatprep.subr.bf16.mxu1 %v4047_v8  ;;  %v3761_v23 = vpack.c.bf16 %v1435_v22, %v1432_v14  ;;  %v1434_v20 = vld [vmem:[#allocation9 + $0xd8] sm:$0xff]  ;;  %v3797_v14 = vpack.c.bf16 %v1430_v3, %v1427_v56  ;;  %v1433_v22 = vld [vmem:[#allocation9 + $0xd0] sm:$0xff] }
 0x2b4   : > { %v3763_v17 = vpack.c.bf16 %v1434_v20, %v1431_v28  ;;  %v1436_v28 = vld [vmem:[#allocation9 + $0xe8] sm:$0xff] }
 0x2b5   : > { %v3801_v20 = vpack.c.bf16 %v1436_v28, %v1433_v22 }
 0x2b6   : > { %2673 = vmatpush1.bf16.msra.mxu0 %v2672_v36  ;;  %2698 = vmatpush3.bf16.msra.mxu1 %v2697_v42  ;;  %v1440_v36 = vld [vmem:[#allocation9 + $0x108] sm:$0xff] }
 0x2b7   : > { %2675 = vmatprep.subr.bf16.mxu0 %v2674_v27  ;;  %2699 = vmatprep.subr.bf16.mxu1 %v4047_v8  ;;  %v3769_v42 = vpack.c.bf16 %v1440_v36, %v1437_v31  ;;  %v1447_v27 = vld [vmem:[#allocation9 + $0x140] sm:$0xff]  ;;  %v3805_v31 = vpack.c.bf16 %v1442_v30, %v1439_v0  ;;  %v1445_v36 = vld [vmem:[#allocation9 + $0x130] sm:$0xff]  ;;  %v540_v30 = vmul.f32 %v3614_v62, %v515_v35 }
 0x2b8   : > { %v3773_v43 = vpack.c.bf16 %v1447_v27, %v1444_v25  ;;  %v1448_v25 = vld [vmem:[#allocation9 + $0x148] sm:$0xff] }
 0x2b9   : > { %v3809_v27 = vpack.c.bf16 %v1448_v25, %v1445_v36 }
 0x2ba   : > { %2677 = vmatpush1.bf16.msra.mxu0 %v2676_v49  ;;  %2701 = vmatpush3.bf16.msra.mxu1 %v2700_v52  ;;  %v3775_v49 = vpack.c.bf16 %v1446_v40, %v1443_v15  ;;  %v1409_v52 = vld [vmem:[#allocation9 + $0x10] sm:$0xff]  ;;  %v1451_v15 = vld [vmem:[#allocation9 + $0x160] sm:$0xff]  ;;  %v1454_v40 = vld [vmem:[#allocation9 + $0x178] sm:$0xff] }
 0x2bb   : > { %2734 = vmatprep.subr.bf16.mxu1 %v4047_v8  ;;  %2703 = vmatprep.subr.bf16.mxu0 %v3737_v61  ;;  %v3778_v51 = vpack.c.bf16 %v1412_v50, %v1409_v52  ;;  %v3813_v52 = vpack.c.bf16 %v1454_v40, %v1451_v15  ;;  %v419_v50 = vpop.permute.xlu1 %418 }
 0x2bc   : > { %v444_v37 = vmul.f32 %v3595_v47, %v419_v50 }
 0x2bd   : > { %1300 = vmatmul.mubr.f32.vlgmr.msra.gmra.mrb[6].mxu0 %v3653_v13  ;;  %2365 = vmatmul.mubr.f32.vlgmr.msra.gmra.mrb[6].mxu1 %v3653_v13  ;;  %v1410_v13 = vld [vmem:[#allocation9 + $0x18] sm:$0xff] }
 0x2be   : > { %1305 = vmatprep.mubr.f32.mxu0 %v4048_v2  ;;  %2367 = vmatprep.mubr.msk.f32.mxu1 %vm3201_vm0, %v4048_v2  ;;  %v3739_v10 = vpack.c.bf16 %v1410_v13, %v1407_v7  ;;  %v1450_v7 = vld [vmem:[#allocation9 + $0x158] sm:$0xff]  ;;  %v1453_v13 = vld [vmem:[#allocation9 + $0x170] sm:$0xff]  ;;  %v453_v3 = vadd.f32 %v444_v37, %v3603_v53 }
 0x2bf   : > { %2736 = vmatpush3.bf16.msra.mxu1 %v3778_v51  ;;  %v3782_v11 = vpack.c.bf16 %v1453_v13, %v1450_v7  ;;  %v443_v7 = vmul.f32 %v3571_v33, %v419_v50  ;;  %v467_v13 = vpop.permute.xlu1 %466 }
 0x2c0   : > { %2705 = vmatpush1.bf16.msra.mxu0 %v3739_v10  ;;  %2737 = vmatprep.subr.bf16.mxu1 %v4047_v8  ;;  %v491_v24 = vmul.f32 %v3586_v41, %v467_v13  ;;  %v492_v22 = vmul.f32 %v3611_v60, %v467_v13  ;;  %v445_v60 = vmul.f32 %v3627_v58, %v419_v50 }
 0x2c1   : > { %1306 = vmatmul.mubr.f32.gmra.mrb[8].mxu0 %v3712_v16  ;;  %2368 = vmatmul.mubr.f32.gmra.mrb[8].mxu1 %v3712_v16  ;;  %v452_v18 = vadd.f32 %v443_v7, %v3582_v39 }
 0x2c2   : > { %1311 = vmatprep.mubr.f32.mxu0 %v4048_v2  ;;  %2370 = vmatprep.mubr.msk.f32.mxu1 %vm3201_vm0, %v4048_v2  ;;  %v501_v33 = vadd.f32 %v492_v22, %v453_v3  ;;  %v454_v62 = vadd.f32 %v445_v60, %v3630_v6  ;;  %v541_v3 = vmul.f32 %v3637_v63, %v515_v35 }
 0x2c3   : > { %2707 = vmatprep.subr.bf16.mxu0 %v3743_v19  ;;  %2739 = vmatpush3.bf16.msra.mxu1 %v3788_v44  ;;  %v500_v48 = vadd.f32 %v491_v24, %v452_v18  ;;  %v563_v56 = vpop.permute.xlu1 %562 }
 0x2c4   : > { %2709 = vmatpush1.bf16.msra.mxu0 %v3745_v32  ;;  %2740 = vmatprep.subr.bf16.mxu1 %v4047_v8  ;;  %v587_v0 = vmul.f32 %v3606_v55, %v563_v56  ;;  %v549_v40 = vadd.f32 %v540_v30, %v501_v33  ;;  %v588_v45 = vmul.f32 %v3621_v21, %v563_v56 }
 0x2c5   : > { %2711 = vmatprep.subr.bf16.mxu0 %v3749_v38  ;;  %v548_v28 = vadd.f32 %v539_v54, %v500_v48  ;;  %v493_v48 = vmul.f32 %v3634_v12, %v467_v13  ;;  %v589_v21 = vmul.f32 %v3643_v4, %v563_v56 }
 0x2c6   : > { %v597_v53 = vadd.f32 %v588_v45, %v549_v40 }
 0x2c7   : > { %2742 = vmatpush3.bf16.msra.mxu1 %v3794_v1  ;;  %v596_v39 = vadd.f32 %v587_v0, %v548_v28  ;;  %v502_v54 = vadd.f32 %v493_v48, %v454_v62 }
 0x2c8   : > { %2713 = vmatpush1.bf16.msra.mxu0 %v3751_v46  ;;  %2743 = vmatprep.subr.bf16.mxu1 %v4047_v8 }
 0x2c9   : > { %2715 = vmatprep.subr.bf16.mxu0 %v3755_v57  ;;  %v550_v22 = vadd.f32 %v541_v3, %v502_v54 }
 0x2cb   : > { %2745 = vmatpush3.bf16.msra.mxu1 %v3797_v14  ;;  %v598_v58 = vadd.f32 %v589_v21, %v550_v22 }
 0x2cc   : > { %2717 = vmatpush1.bf16.msra.mxu0 %v3757_v5  ;;  %2746 = vmatprep.subr.bf16.mxu1 %v4047_v8 }
 0x2cd   : > { %2719 = vmatprep.subr.bf16.mxu0 %v3761_v23 }
 0x2cf   : > { %2748 = vmatpush3.bf16.msra.mxu1 %v3801_v20 }
 0x2d0   : > { %2721 = vmatpush1.bf16.msra.mxu0 %v3763_v17  ;;  %2749 = vmatprep.subr.bf16.mxu1 %v4047_v8 }
 0x2d1   : > { %2723 = vmatprep.subr.bf16.mxu0 %v3767_v9 }
 0x2d3   : > { %2751 = vmatpush3.bf16.msra.mxu1 %v3805_v31 }
 0x2d4   : > { %2725 = vmatpush1.bf16.msra.mxu0 %v3769_v42  ;;  %2752 = vmatprep.subr.bf16.mxu1 %v4047_v8 }
 0x2d5   : > { %2727 = vmatprep.subr.bf16.mxu0 %v3773_v43 }
 0x2d7   : > { %2754 = vmatpush3.bf16.msra.mxu1 %v3809_v27 }
 0x2d8   : > { %2729 = vmatpush1.bf16.msra.mxu0 %v3775_v49  ;;  %2755 = vmatprep.subr.bf16.mxu1 %v4047_v8 }
 0x2d9   : > { %2731 = vmatprep.subr.bf16.mxu0 %v3782_v11 }
 0x2db   : > { %2757 = vmatpush3.bf16.msra.mxu1 %v3813_v52 }
 0x2dc   : > { %2733 = vmatpush1.bf16.msra.mxu0 %v3784_v26  ;;  %2790 = vmatprep.subr.bf16.mxu1 %v4047_v8 }
 0x2dd   : > { %2759 = vmatprep.subr.bf16.mxu0 %v3737_v61 }
 0x370   : > { %v1067_v36 = vpop.f32.mrb[4].mxu0  ;;  %v1138_v41 = vpop.f32.mrb[4].mxu1 }
 0x371   : > { %v1142_v25 = vadd.f32 %v1067_v36, %v596_v39  ;;  %v1069_v15 = vpop.f32.mrb[5].mxu0  ;;  %v2331_v47 = vpop.f32.mrb[5].mxu1  ;;  %v1156_v0 = vadd.f32 %v3648_v34, %v1138_v41  ;;  %v3840_v34 = vld [vmem:[#allocation3 + $0x8] sm:$0xff] }
 0x372   : > { %v1149_v18 = vadd.f32 %v1069_v15, %v597_v53 }
 0x373   : > { %v2090_v7 = vmul.f32 -1.442695, %v1142_v25 }
 0x374   : > { %v2091_v24 = vmul.f32 -1.442695, %v1149_v18 }
 0x375   : > { %2997 = vpow2.f32 %v2090_v7 }
 0x376   : > { %2999 = vpow2.f32 %v2091_v24 }
 0x37f   : > { %v2998_v55 = vpop.eup %2997 }
 0x380   : > { %v1146_v37 = vadd.f32 1.0, %v2998_v55  ;;  %v3000_v28 = vpop.eup %2999 }
 0x381   : > { %v1153_v39 = vadd.f32 1.0, %v3000_v28 }
 0x382   : > { %3001 = vrcp.f32 %v1146_v37 }
 0x38c   : > { %v3002_v33 = vpop.eup %3001 }
 0x38d   : > { %v1157_v50 = vmul.f32 %v3002_v33, %v1156_v0 }
 0x38f   : > { %v1158_v30 = vadd.f32 %v1157_v50, %v598_v58 }
 0x390   : > { %v3834_v36 = vpop.f32.mrb[6].mxu1 }
 0x391   : > { %3003 = vtanh.f32 %v1158_v30  ;;  %v2366_v6 = vpop.f32.mrb[7].mxu1 }
 0x392   : > { %3005 = vrcp.f32 %v1153_v39 }
 0x394   : > { %v3836_v12 = vpop.f32.mrb[8].mxu1 }
 0x395   : > { %v2369_v13 = vpop.f32.mrb[9].mxu1 }
 0x39b   : > { %v3004_v63 = vpop.eup %3003 }
 0x39c   : > { %v1160_v35 = vsub.f32 %v3712_v16, %v3004_v63  ;;  %v3006_v4 = vpop.eup %3005  ;;  %v1169_v16 = vld [vmem:[%s4011_s7] sm:$0x7] }
 0x39d   : > { %v3887_v47 = vrot.slane %v1169_v16, %v3565_v29  ;;  %v3897_v29 = vld [vmem:[%s4012_s8] ss:$0 sm:$0xff]  ;;  %v3900_v54 = vrot.slane %v1169_v16, %v3624_v59 }
 0x39e   : > { %v1161_v56 = vmul.f32 %v3006_v4, %v1160_v35 }
 0x39f   : > { %v1385_v28 = vadd.f32 %v3834_v36, %v3900_v54 }
 0x3a0   : > { %v1162_v25 = vadd.f32 %v3004_v63, %v1161_v56 }
 0x3a2   : > { %1165 = vst [vmem:[#allocation3] sm:$0xff] %v1162_v25  ;;  %1312 = vmatmul.mubr.f32.gmra.mrb[10].mxu0 %v1162_v25  ;;  %2371 = vmatmul.mubr.f32.gmra.mrb[10].mxu1 %v1162_v25 }
 0x3a3   : > { %1530 = vmatprep.mubr.f32.mxu0 %v4048_v2  ;;  %2405 = vmatprep.mubr.msk.f32.mxu1 %vm3201_vm0, %v4048_v2 }
 0x3a6   : > { %1531 = vmatmul.mubr.f32.vlgmr.msra.gmra.mrb[6].mxu0 %v3840_v34  ;;  %2406 = vmatmul.mubr.f32.vlgmr.msra.gmra.mrb[12].mxu1 %v3840_v34 }
 0x3a7   : > { %2761 = vmatpush1.bf16.msra.mxu0 %v3739_v10  ;;  %2792 = vmatpush3.bf16.msra.mxu1 %v3778_v51 }
 0x3a8   : > { %2763 = vmatprep.subr.bf16.mxu0 %v3743_v19  ;;  %2793 = vmatprep.subr.bf16.mxu1 %v4047_v8 }
 0x3a9   : > { %1696 = vmatprep.mubr.f32.mxu0 %v4048_v2  ;;  %2440 = vmatprep.mubr.msk.f32.mxu1 %vm3201_vm0, %v4048_v2 }
 0x3ab   : > { %2765 = vmatpush1.bf16.msra.mxu0 %v3745_v32  ;;  %2795 = vmatpush3.bf16.msra.mxu1 %v3788_v44 }
 0x3ac   : > { %2767 = vmatprep.subr.bf16.mxu0 %v3749_v38  ;;  %2796 = vmatprep.subr.bf16.mxu1 %v4047_v8 }
 0x3af   : > { %2769 = vmatpush1.bf16.msra.mxu0 %v3751_v46  ;;  %2798 = vmatpush3.bf16.msra.mxu1 %v3794_v1 }
 0x3b0   : > { %2771 = vmatprep.subr.bf16.mxu0 %v3755_v57  ;;  %2799 = vmatprep.subr.bf16.mxu1 %v4047_v8 }
 0x3b3   : > { %2773 = vmatpush1.bf16.msra.mxu0 %v3757_v5  ;;  %2801 = vmatpush3.bf16.msra.mxu1 %v3797_v14 }
 0x3b4   : > { %2775 = vmatprep.subr.bf16.mxu0 %v3761_v23  ;;  %2802 = vmatprep.subr.bf16.mxu1 %v4047_v8 }
 0x3b7   : > { %2777 = vmatpush1.bf16.msra.mxu0 %v3763_v17  ;;  %2804 = vmatpush3.bf16.msra.mxu1 %v3801_v20 }
 0x3b8   : > { %2779 = vmatprep.subr.bf16.mxu0 %v3767_v9  ;;  %2805 = vmatprep.subr.bf16.mxu1 %v4047_v8 }
 0x3bb   : > { %2781 = vmatpush1.bf16.msra.mxu0 %v3769_v42  ;;  %2807 = vmatpush3.bf16.msra.mxu1 %v3805_v31 }
 0x3bc   : > { %2783 = vmatprep.subr.bf16.mxu0 %v3773_v43  ;;  %2808 = vmatprep.subr.bf16.mxu1 %v4047_v8 }
 0x3bf   : > { %2785 = vmatpush1.bf16.msra.mxu0 %v3775_v49  ;;  %2810 = vmatpush3.bf16.msra.mxu1 %v3809_v27 }
 0x3c0   : > { %2787 = vmatprep.subr.bf16.mxu0 %v3782_v11  ;;  %2811 = vmatprep.subr.bf16.mxu1 %v4047_v8 }
 0x3c3   : > { %2789 = vmatpush1.bf16.msra.mxu0 %v3784_v26  ;;  %2813 = vmatpush3.bf16.msra.mxu1 %v3813_v52 }
 0x3c4   : > { %2815 = vmatprep.subr.bf16.mxu0 %v3737_v61  ;;  %2846 = vmatprep.subr.bf16.mxu1 %v4047_v8  ;;  %v4051_v61 = vld [vmem:[#allocation19_spill] sm:$0xff] }
 0x3c5   : > { %v3891_v24 = vrot.slane %v1169_v16, %v4051_v61 }
 0x475   : > { %v3884_v41 = vpop.f32.mrb[10].mxu1 }
 0x476   : > { %v2372_v15 = vpop.f32.mrb[11].mxu1 }
 0x477   : > { %v1395_v15 = vadd.f32 %v3884_v41, %v3900_v54 }
 0x479   : > { %v1532_v40 = vpop.f32.mrb[6].mxu0  ;;  %v1603_v45 = vpop.f32.mrb[12].mxu1 }
 0x47a   : > { %v2870_v7 = vadd.f32 %v1532_v40, %v3887_v47  ;;  %v1534_v53 = vpop.f32.mrb[7].mxu0  ;;  %v2407_v18 = vpop.f32.mrb[13].mxu1  ;;  %v1621_v3 = vadd.f32 %v3897_v29, %v1603_v45 }
 0x47b   : > { %v2871_v55 = vadd.f32 %v1534_v53, %v3891_v24 }
 0x47c   : > { %v2094_v60 = vmul.f32 -1.442695, %v2870_v7 }
 0x47d   : > { %v2095_v37 = vmul.f32 -1.442695, %v2871_v55 }
 0x47e   : > { %3007 = vpow2.f32 %v2094_v60 }
 0x47f   : > { %3009 = vpow2.f32 %v2095_v37 }
 0x488   : > { %v3008_v62 = vpop.eup %3007 }
 0x489   : > { %v1611_v48 = vadd.f32 1.0, %v3008_v62  ;;  %v3010_v22 = vpop.eup %3009 }
 0x48a   : > { %v1618_v33 = vadd.f32 1.0, %v3010_v22 }
 0x48b   : > { %3011 = vrcp.f32 %v1611_v48 }
 0x495   : > { %v3012_v21 = vpop.eup %3011 }
 0x496   : > { %v1622_v0 = vmul.f32 %v3012_v21, %v1621_v3 }
 0x498   : > { %v1623_v58 = vadd.f32 %v1622_v0, %v1385_v28 }
 0x49a   : > { %3013 = vtanh.f32 %v1623_v58 }
 0x49b   : > { %3015 = vrcp.f32 %v1618_v33 }
 0x4a4   : > { %v3014_v50 = vpop.eup %3013 }
 0x4a5   : > { %v1625_v30 = vsub.f32 %v3840_v34, %v3014_v50  ;;  %v3016_v39 = vpop.eup %3015 }
 0x4a7   : > { %v1626_v6 = vmul.f32 %v3016_v39, %v1625_v30 }
 0x4a9   : > { %v1627_v59 = vadd.f32 %v3014_v50, %v1626_v6 }
 0x4ab   : > { %1697 = vmatmul.mubr.f32.vlgmr.msra.gmra.mrb[8].mxu0 %v1627_v59  ;;  %1628 = vst [vmem:[%s3426_s15] sm:$0xff] %v1627_v59  ;;  %2441 = vmatmul.mubr.f32.vlgmr.msra.gmra.mrb[14].mxu1 %v1627_v59 }
 0x4ac   : > { %2817 = vmatpush1.bf16.msra.mxu0 %v3739_v10  ;;  %2848 = vmatpush3.bf16.msra.mxu1 %v3778_v51 }
 0x4ad   : > { %2819 = vmatprep.subr.bf16.mxu0 %v3743_v19  ;;  %2849 = vmatprep.subr.bf16.mxu1 %v4047_v8 }
 0x4ae   : > { %1862 = vmatprep.mubr.f32.mxu0 %v4048_v2  ;;  %2475 = vmatprep.mubr.msk.f32.mxu1 %vm3201_vm0, %v4048_v2 }
 0x4b0   : > { %2821 = vmatpush1.bf16.msra.mxu0 %v3745_v32  ;;  %2851 = vmatpush3.bf16.msra.mxu1 %v3788_v44 }
 0x4b1   : > { %2823 = vmatprep.subr.bf16.mxu0 %v3749_v38  ;;  %2852 = vmatprep.subr.bf16.mxu1 %v4047_v8 }
 0x4b4   : > { %2825 = vmatpush1.bf16.msra.mxu0 %v3751_v46  ;;  %2854 = vmatpush3.bf16.msra.mxu1 %v3794_v1 }
 0x4b5   : > { %2827 = vmatprep.subr.bf16.mxu0 %v3755_v57  ;;  %2855 = vmatprep.subr.bf16.mxu1 %v4047_v8 }
 0x4b8   : > { %2829 = vmatpush1.bf16.msra.mxu0 %v3757_v5  ;;  %2857 = vmatpush3.bf16.msra.mxu1 %v3797_v14 }
 0x4b9   : > { %2831 = vmatprep.subr.bf16.mxu0 %v3761_v23  ;;  %2858 = vmatprep.subr.bf16.mxu1 %v4047_v8 }
 0x4bc   : > { %2833 = vmatpush1.bf16.msra.mxu0 %v3763_v17  ;;  %2860 = vmatpush3.bf16.msra.mxu1 %v3801_v20 }
 0x4bd   : > { %2835 = vmatprep.subr.bf16.mxu0 %v3767_v9  ;;  %2861 = vmatprep.subr.bf16.mxu1 %v4047_v8 }
 0x4c0   : > { %2837 = vmatpush1.bf16.msra.mxu0 %v3769_v42  ;;  %2863 = vmatpush3.bf16.msra.mxu1 %v3805_v31 }
 0x4c1   : > { %2839 = vmatprep.subr.bf16.mxu0 %v3773_v43  ;;  %2864 = vmatprep.subr.bf16.mxu1 %v4047_v8  ;;  %v1390_v43 = vadd.f32 %v3836_v12, %v3900_v54 }
 0x4c4   : > { %2841 = vmatpush1.bf16.msra.mxu0 %v3775_v49  ;;  %2866 = vmatpush3.bf16.msra.mxu1 %v3809_v27 }
 0x4c5   : > { %2843 = vmatprep.subr.bf16.mxu0 %v3782_v11  ;;  %2867 = vmatprep.subr.bf16.mxu1 %v4047_v8 }
 0x4c8   : > { %2845 = vmatpush1.bf16.msra.mxu0 %v3784_v26  ;;  %2869 = vmatpush3.bf16.msra.mxu1 %v3813_v52 }
 0x57e   : > { %v1698_v2 = vpop.f32.mrb[8].mxu0  ;;  %v1769_v10 = vpop.f32.mrb[14].mxu1 }
 0x57f   : > { %v2872_v19 = vadd.f32 %v1698_v2, %v3887_v47  ;;  %v1700_v32 = vpop.f32.mrb[9].mxu0  ;;  %v2442_v38 = vpop.f32.mrb[15].mxu1  ;;  %v1787_v9 = vadd.f32 %v3897_v29, %v1769_v10 }
 0x580   : > { %v2873_v57 = vadd.f32 %v1700_v32, %v3891_v24 }
 0x581   : > { %v2096_v46 = vmul.f32 -1.442695, %v2872_v19 }
 0x582   : > { %v2097_v5 = vmul.f32 -1.442695, %v2873_v57 }
 0x583   : > { %3017 = vpow2.f32 %v2096_v46 }
 0x584   : > { %3019 = vpow2.f32 %v2097_v5 }
 0x58d   : > { %v3018_v23 = vpop.eup %3017 }
 0x58e   : > { %v1777_v17 = vadd.f32 1.0, %v3018_v23  ;;  %v3020_v8 = vpop.eup %3019 }
 0x58f   : > { %v1784_v11 = vadd.f32 1.0, %v3020_v8 }
 0x590   : > { %3021 = vrcp.f32 %v1777_v17 }
 0x59a   : > { %v3022_v42 = vpop.eup %3021 }
 0x59b   : > { %v1788_v49 = vmul.f32 %v3022_v42, %v1787_v9 }
 0x59d   : > { %v1789_v51 = vadd.f32 %v1788_v49, %v1390_v43 }
 0x59f   : > { %3023 = vtanh.f32 %v1789_v51 }
 0x5a0   : > { %3025 = vrcp.f32 %v1784_v11 }
 0x5a9   : > { %v3024_v26 = vpop.eup %3023 }
 0x5aa   : > { %v1791_v44 = vsub.f32 %v1627_v59, %v3024_v26  ;;  %v3026_v1 = vpop.eup %3025 }
 0x5ac   : > { %v1792_v14 = vmul.f32 %v3026_v1, %v1791_v44 }
 0x5ae   : > { %v1793_v20 = vadd.f32 %v3024_v26, %v1792_v14 }
 0x5b0   : > { %1863 = vmatmul.mubr.f32.vlgmr.msra.gmra.mrb[10].mxu0 %v1793_v20  ;;  %2098 = vst [vmem:[%s3426_s15 + $0x8] sm:$0xff] %v1793_v20  ;;  %2476 = vmatmul.mubr.f32.vlgmr.msra.gmra.mrb[16].mxu1 %v1793_v20 }
 0x683   : > { %v1864_v31 = vpop.f32.mrb[10].mxu0  ;;  %v1935_v27 = vpop.f32.mrb[16].mxu1 }
 0x684   : > { %v2874_v52 = vadd.f32 %v1864_v31, %v3887_v47  ;;  %v1866_v36 = vpop.f32.mrb[11].mxu0  ;;  %v2477_v13 = vpop.f32.mrb[17].mxu1  ;;  %v1953_v34 = vadd.f32 %v3897_v29, %v1935_v27 }
 0x685   : > { %v2875_v63 = vadd.f32 %v1866_v36, %v3891_v24 }
 0x686   : > { %v2099_v12 = vmul.f32 -1.442695, %v2874_v52 }
 0x687   : > { %v2100_v35 = vmul.f32 -1.442695, %v2875_v63 }
 0x688   : > { %3027 = vpow2.f32 %v2099_v12 }
 0x689   : > { %3029 = vpow2.f32 %v2100_v35 }
 0x692   : > { %v3028_v4 = vpop.eup %3027 }
 0x693   : > { %v1943_v56 = vadd.f32 1.0, %v3028_v4  ;;  %v3030_v25 = vpop.eup %3029 }
 0x694   : > { %v1950_v45 = vadd.f32 1.0, %v3030_v25 }
 0x695   : > { %3031 = vrcp.f32 %v1943_v56 }
 0x69f   : > { %v3032_v16 = vpop.eup %3031 }
 0x6a0   : > { %v1954_v47 = vmul.f32 %v3032_v16, %v1953_v34 }
 0x6a2   : > { %v1955_v40 = vadd.f32 %v1954_v47, %v1395_v15 }
 0x6a4   : > { %3033 = vtanh.f32 %v1955_v40 }
 0x6a5   : > { %3035 = vrcp.f32 %v1950_v45 }
 0x6ae   : > { %v3034_v7 = vpop.eup %3033 }
 0x6af   : > { %v1957_v53 = vsub.f32 %v1793_v20, %v3034_v7  ;;  %v3036_v18 = vpop.eup %3035 }
 0x6b1   : > { %v1958_v60 = vmul.f32 %v3036_v18, %v1957_v53 }
 0x6b3   : > { %v1959_v41 = vadd.f32 %v3034_v7, %v1958_v60 }
 0x6b5   : > { %1961 = vst [vmem:[#allocation3 + $0x8] sm:$0xff] %v1959_v41  ;;  %2101 = vst [vmem:[%s3426_s15 + $0x10] sm:$0xff] %v1959_v41 }
 0x6b6   : > { %3134 = shalt.err (!%p3131_p10)
}
 0x6b7   : > { %s3135_s18 = scalar_lea.hbm %s3956_s29, 384  ;;  %s3139_s28 = scalar_lea.hbm %s4013_s9, 1152 }
 0x6b8   : > { %p3136_p1 = scmp.ne.s32.totalorder %s3956_s29, %s3135_s18  ;;  %p3140_p11 = scmp.lt.u32.totalorder %s3956_s29, %s4013_s9 }
 0x6b9   : > { %p3141_p13 = scmp.lt.u32.totalorder %s3139_s28, %s3135_s18  ;;  %p3143_p7 = scmp.lt.u32.totalorder %s3135_s18, %s3956_s29 }
 0x6ba   : > { %p3137_p3 = pnand %p3136_p1, %p4052_p8 }
 0x6bb   : > { %p3142_p4 = por %p3141_p13, %p3140_p11 }
 0x6bc   : > { %p3138_p5 = pneg %p3137_p3 }
 0x6bd   : > { %p3144_p12 = por %p3143_p7, %p3142_p4 }
 0x6bf   : > { %p3145_p0 = pnand %p3144_p12, %p3138_p5 }
 0x6c1   : > { %3148 = shalt.err (!%p3145_p0)
}
 0x6c2   : > { %s3207_s11 = smov 128   ;;  %s3208_s20 = smov 8  }
 0x6c3   : > { %2895 = dma.vmem_to_hbm [thread:$0]  (%p4052_p8), %s3958_s22, 384, %s3956_s29, %s3963_s23, %s3207_s11, %s3207_s11, %s3208_s20  }
 0x6c4 PF: > { %s4053_s17 = sld [smem:[#allocation14_spill]]  ;;  %s4054_s25 = sld [smem:[#allocation18_spill]] }
 0x6c5   : > { %p2917_p2 = scmp.ge.s32.totalorder %s3191_s12, 2 }
 0x6ca   : > { %s1991_s27 = sand.u32 1, %s4053_s17   ;;  %p4055_p6 = scmp.ne.s32.totalorder %s4054_s25, 0 }
 0x6cb   : > { %s1992_s13 = scalar_lea.sflag [#allocation6], %s1991_s27 }
 0x6cc   : > { %p2908_p9 = pnand %p2917_p2, %p4055_p6 }
 0x6ce   : > { %3174 = dma.done.wait (!%p2908_p9), %s1992_s13, 384  }
 0x6cf   : > { %3176 = vsyncadd (!%p2908_p9), %s1992_s13, 4294966912  ;;  %s4056_s12 = sld [smem:[#allocation16_spill]]  ;;  %s4057_s26 = sld [smem:[#allocation15_spill]] }
 0x6d0   : > { %s4058_s11 = sld [smem:[#allocation17_spill]]  ;;  %s4059_s30 = smov %s3183_s10 }
 0x6d5   : > { %p21_p10 = scmp.ge.s32.totalorder %s4056_s12, 5   ;;  %s4060_s10 = smov %s4057_s26 }
 0x6d7   :  { %23 = sbr.rel (!%p21_p10) target bundleno = 5 (0x5), region = 116 }
 0x6de   :  { %1997 = vsyncpa [#allocation5], 1 }
 0x6df   :  { %1999 = vsyncpa [#allocation5 + $0x1], 1 }
 0x6e0   :  { %2000 = vsyncpa [#allocation8], 1 }
 0x6e1   :  { %2001 = vsyncpa [#allocation6], 1 }
 0x6e2   :  { %2003 = vsyncpa [#allocation6 + $0x1], 1 }

</bundles_post_ra>
